<compile_context>
chip_gen: v7x
topology: tpu7x:2x2x1
jax: 0.10.0
libtpu: 0.0.40
codegen_flags: <defaults>
</compile_context>

<pallas_src>
import functools

import jax
import jax.numpy as jnp
from jax import lax
from jax.experimental import pallas as pl
from jax.experimental.pallas import tpu as pltpu

EPS = 1e-5


def _conv_pool_stats_kernel(x_ref, w_ref, b_ref, pooled_ref, sum_ref, sq_ref,
                            *, W2, F, Wp):
    """Conv3x3 + ReLU + MaxPool(2,2) + per-image BN partial stats, one image/step.

    x_ref      : (1, 2, 2, PAD, Cin) bf16  space-to-depth(2x2) input, flat spatial
    w_ref      : (9*Cin, Cout)       bf16  conv weight, rows ordered (kh, kw, ci)
    b_ref      : (1, Cout)           f32   conv bias
    pooled_ref : (1, F, Cout)        f32   relu(bias + maxpool(conv)); row f = hp*W2 + wp
    sum_ref    : (1, 1, Cout)        f32   per-image sum   over valid pooled positions
    sq_ref     : (1, 1, Cout)        f32   per-image sumsq over valid pooled positions
    """
    # In-register im2col: for each conv tap (kh,kw) stack the 4 pool-offset
    # groups g=(ph,pw) along rows (each group reads a CONTIGUOUS slice of the
    # space-to-depth slab (dy,dx) at offset s), then lane-concat the 9 taps.
    cols = []
    for kh in range(3):
        for kw in range(3):
            rows = []
            for ph in range(2):
                for pw in range(2):
                    dy, q = (ph + kh) % 2, (ph + kh) // 2
                    dx, r = (pw + kw) % 2, (pw + kw) // 2
                    s = q * W2 + r
                    rows.append(x_ref[0, dy, dx, s:s + F, :])       # (F, Cin)
            cols.append(jnp.concatenate(rows, axis=0))              # (4F, Cin)
    patch = jnp.concatenate(cols, axis=1)                           # (4F, 9*Cin) bf16

    # Single MXU matmul for the whole image (bf16 in, f32 accumulate).
    conv = jnp.dot(patch, w_ref[...], preferred_element_type=jnp.float32)  # (4F, Cout)

    # MaxPool2d(2,2): elementwise max across the 4 pool-offset slabs.
    pooled = conv[0:F]
    for g in range(1, 4):
        pooled = jnp.maximum(pooled, conv[g * F:(g + 1) * F])
    # Bias + ReLU hoisted after the max — exact because both are monotone.
    pooled = jnp.maximum(pooled + b_ref[...], 0.0)                  # (F, Cout) f32
    pooled_ref[0] = pooled

    # BatchNorm partial statistics; mask the wp == Wp wrap column (garbage).
    col = lax.broadcasted_iota(jnp.int32, pooled.shape, 0) % W2
    pv = jnp.where(col < Wp, pooled, 0.0)
    sum_ref[0] = jnp.sum(pv, axis=0, keepdims=True)
    sq_ref[0] = jnp.sum(pv * pv, axis=0, keepdims=True)


def _bn_apply_kernel(y_ref, scale_ref, shift_ref, o_ref):
    """Per-channel affine normalization: out = y * scale + shift."""
    o_ref[...] = y_ref[...] * scale_ref[...] + shift_ref[...]


def block_forward(x_nchw, w_hwio, bias, gamma, beta, pool_k, pool_s):
    N, Cin, H, W = x_nchw.shape
    KH, KW, _, Cout = w_hwio.shape
    assert (KH, KW) == (3, 3)
    # TODO(synk): only the MaxPool2d(kernel=2, stride=2) configuration (as used by
    #             the original script) is implemented; general pool params need a
    #             space-to-depth factor of pool_s and re-derived slab bounds.
    assert pool_k == 2 and pool_s == 2 and H % 2 == 0 and W % 2 == 0

    H2, W2 = H // 2, W // 2
    Hp, Wp = H2 - 1, W2 - 1               # pooled spatial dims (= ((H-2)-2)//2 + 1)
    F = Hp * W2                           # rows per pool-offset slab (incl. wrap col)
    PAD = H2 * W2 + W2                    # flat rows + spare slab for shifted slices
    K9 = KH * KW * Cin

    # ---- glue (plain JAX): pure layout, NO replication, one HBM pass ----
    # NCHW -> NHWC -> space-to-depth(2x2) -> flatten spatial -> zero-pad -> bf16.
    x = jnp.transpose(x_nchw, (0, 2, 3, 1))
    xg = x.reshape(N, H2, 2, W2, 2, Cin).transpose(0, 2, 4, 1, 3, 5)
    xg = xg.reshape(N, 2, 2, H2 * W2, Cin)
    xg = jnp.pad(xg, ((0, 0), (0, 0), (0, 0), (0, PAD - H2 * W2), (0, 0)))
    xg = xg.astype(jnp.bfloat16)

    wmat = w_hwio.reshape(K9, Cout).astype(jnp.bfloat16)   # rows ordered (kh, kw, ci)
    b2 = bias.reshape(1, Cout).astype(jnp.float32)

    # ---- pass 1: conv + relu + maxpool + per-image BN partials (grid over N) ----
    kern = functools.partial(_conv_pool_stats_kernel, W2=W2, F=F, Wp=Wp)
    pooled, psum, psq = pl.pallas_call(
        kern,
        out_shape=(
            jax.ShapeDtypeStruct((N, F, Cout), jnp.float32),
            jax.ShapeDtypeStruct((N, 1, Cout), jnp.float32),
            jax.ShapeDtypeStruct((N, 1, Cout), jnp.float32),
        ),
        grid=(N,),
        in_specs=[
            pl.BlockSpec((1, 2, 2, PAD, Cin), lambda i: (i, 0, 0, 0, 0)),
            pl.BlockSpec((K9, Cout), lambda i: (0, 0)),
            pl.BlockSpec((1, Cout), lambda i: (0, 0)),
        ],
        out_specs=(
            pl.BlockSpec((1, F, Cout), lambda i: (i, 0, 0)),
            pl.BlockSpec((1, 1, Cout), lambda i: (i, 0, 0)),
            pl.BlockSpec((1, 1, Cout), lambda i: (i, 0, 0)),
        ),
        compiler_params=pltpu.CompilerParams(dimension_semantics=("parallel",)),
    )(xg, wmat, b2)

    # ---- global BatchNorm stats: tiny (N, Cout) reduction in plain JAX ----
    count = N * Hp * Wp
    mean = jnp.sum(psum, axis=(0, 1)) / count
    var = jnp.maximum(jnp.sum(psq, axis=(0, 1)) / count - mean * mean, 0.0)  # biased
    rstd = lax.rsqrt(var + EPS)
    scale = (gamma * rstd).reshape(1, Cout).astype(jnp.float32)
    shift = (beta - mean * gamma * rstd).reshape(1, Cout).astype(jnp.float32)

    # ---- pass 2: apply BatchNorm affine (grid over N) ----
    out = pl.pallas_call(
        _bn_apply_kernel,
        out_shape=jax.ShapeDtypeStruct((N, F, Cout), jnp.float32),
        grid=(N,),
        in_specs=[
            pl.BlockSpec((1, F, Cout), lambda i: (i, 0, 0)),
            pl.BlockSpec((1, Cout), lambda i: (0, 0)),
            pl.BlockSpec((1, Cout), lambda i: (0, 0)),
        ],
        out_specs=pl.BlockSpec((1, F, Cout), lambda i: (i, 0, 0)),
        compiler_params=pltpu.CompilerParams(dimension_semantics=("parallel",)),
    )(pooled, scale, shift)

    # rows f = hp*W2 + wp : drop the wp == Wp wrap column, back to NCHW.
    out = out.reshape(N, Hp, W2, Cout)[:, :, :Wp, :]
    return jnp.transpose(out, (0, 3, 1, 2))


def ref_forward(x_nchw, w_hwio, bias, gamma, beta, pool_k, pool_s):
    """Pure-JAX reference.  The conv inputs are rounded to bf16 exactly like the
    kernel (accumulation in f32), so the comparison isolates kernel correctness."""
    x = jnp.transpose(x_nchw, (0, 2, 3, 1)).astype(jnp.bfloat16).astype(jnp.float32)
    w = w_hwio.astype(jnp.bfloat16).astype(jnp.float32)
    y = lax.conv_general_dilated(x, w, (1, 1), 'VALID',
                                 dimension_numbers=('NHWC', 'HWIO', 'NHWC'))
    y = jnp.maximum(y + bias, 0.0)
    y = lax.reduce_window(y, -jnp.inf, lax.max,
                          (1, pool_k, pool_k, 1), (1, pool_s, pool_s, 1), 'VALID')
    mean = jnp.mean(y, axis=(0, 1, 2))
    var = jnp.mean((y - mean) ** 2, axis=(0, 1, 2))
    y = (y - mean) * lax.rsqrt(var + EPS) * gamma + beta
    return jnp.transpose(y, (0, 3, 1, 2))


if __name__ == "__main__":
    # block(in_channels=4, out_channels=8, kernel_size=2, stride=2)
    N, Cin, H, W = 2, 4, 16, 16
    Cout, pool_k, pool_s = 8, 2, 2

    key = jax.random.PRNGKey(0)
    k1, k2, k3, k4, k5 = jax.random.split(key, 5)
    w_hwio = jax.random.normal(k1, (3, 3, Cin, Cout), jnp.float32) * 0.1   # conv weight
    bias   = jax.random.normal(k2, (Cout,), jnp.float32) * 0.1             # conv bias
    gamma  = 1.0 + 0.1 * jax.random.normal(k3, (Cout,), jnp.float32)       # BN weight
    beta   = 0.1 * jax.random.normal(k4, (Cout,), jnp.float32)             # BN bias
    x      = jax.random.normal(k5, (N, Cin, H, W), jnp.float32)

    out = jax.block_until_ready(block_forward(x, w_hwio, bias, gamma, beta, pool_k, pool_s))
    ref = ref_forward(x, w_hwio, bias, gamma, beta, pool_k, pool_s)

    Hp = (H - 2 - pool_k) // pool_s + 1
    Wp = (W - 2 - pool_k) // pool_s + 1
    assert out.shape == (N, Cout, Hp, Wp), out.shape
    max_err = float(jnp.max(jnp.abs(out - ref)))
    assert jnp.allclose(out, ref, rtol=5e-3, atol=5e-3), max_err

    print("KERNEL_OK")
</pallas_src>

<mosaic_0001>
module attributes {stable_mosaic.version = 11 : i64} {
  func.func @_conv_pool_stats_kernel(%arg0: i32, %arg1: memref<1x2x2x72x4xbf16, #tpu.memory_space<vmem>>, %arg2: memref<36x8xbf16, #tpu.memory_space<vmem>>, %arg3: memref<1x8xf32, #tpu.memory_space<vmem>>, %arg4: memref<1x56x8xf32, #tpu.memory_space<vmem>>, %arg5: memref<1x1x8xf32, #tpu.memory_space<vmem>>, %arg6: memref<1x1x8xf32, #tpu.memory_space<vmem>>) attributes {dimension_semantics = [#tpu.dimension_semantics<parallel>], iteration_bounds = array<i64: 2>, scalar_prefetch = 0 : i64, scratch_operands = 0 : i64, tpu.core_type = #tpu.core_type<tc>, window_params = [{transform_indices = @transform_0, window_bounds = array<i64: 1, 2, 2, 72, 4>}, {pipeline_mode = #tpu.pipeline_mode<synchronous>, transform_indices = @transform_1, window_bounds = array<i64: 36, 8>}, {pipeline_mode = #tpu.pipeline_mode<synchronous>, transform_indices = @transform_2, window_bounds = array<i64: 1, 8>}, {transform_indices = @transform_3, window_bounds = array<i64: 1, 56, 8>}, {transform_indices = @transform_4, window_bounds = array<i64: 1, 1, 8>}, {transform_indices = @transform_5, window_bounds = array<i64: 1, 1, 8>}]} {
    %c0 = arith.constant 0 : index
    %c0_0 = arith.constant 0 : index
    %c0_1 = arith.constant 0 : index
    %c0_2 = arith.constant 0 : index
    %c0_3 = arith.constant 0 : index
    %0 = vector.load %arg1[%c0, %c0_0, %c0_1, %c0_2, %c0_3] : memref<1x2x2x72x4xbf16, #tpu.memory_space<vmem>>, vector<1x1x1x56x4xbf16>
    %1 = vector.shape_cast %0 : vector<1x1x1x56x4xbf16> to vector<56x4xbf16>
    %c0_4 = arith.constant 0 : index
    %c0_5 = arith.constant 0 : index
    %c1 = arith.constant 1 : index
    %c0_6 = arith.constant 0 : index
    %c0_7 = arith.constant 0 : index
    %2 = vector.load %arg1[%c0_4, %c0_5, %c1, %c0_6, %c0_7] : memref<1x2x2x72x4xbf16, #tpu.memory_space<vmem>>, vector<1x1x1x56x4xbf16>
    %3 = vector.shape_cast %2 : vector<1x1x1x56x4xbf16> to vector<56x4xbf16>
    %c0_8 = arith.constant 0 : index
    %c1_9 = arith.constant 1 : index
    %c0_10 = arith.constant 0 : index
    %c0_11 = arith.constant 0 : index
    %c0_12 = arith.constant 0 : index
    %4 = vector.load %arg1[%c0_8, %c1_9, %c0_10, %c0_11, %c0_12] : memref<1x2x2x72x4xbf16, #tpu.memory_space<vmem>>, vector<1x1x1x56x4xbf16>
    %5 = vector.shape_cast %4 : vector<1x1x1x56x4xbf16> to vector<56x4xbf16>
    %c0_13 = arith.constant 0 : index
    %c1_14 = arith.constant 1 : index
    %c1_15 = arith.constant 1 : index
    %c0_16 = arith.constant 0 : index
    %c0_17 = arith.constant 0 : index
    %6 = vector.load %arg1[%c0_13, %c1_14, %c1_15, %c0_16, %c0_17] : memref<1x2x2x72x4xbf16, #tpu.memory_space<vmem>>, vector<1x1x1x56x4xbf16>
    %7 = vector.shape_cast %6 : vector<1x1x1x56x4xbf16> to vector<56x4xbf16>
    %8 = tpu.concatenate %1, %3, %5, %7 in 0 : vector<56x4xbf16>, vector<56x4xbf16>, vector<56x4xbf16>, vector<56x4xbf16> -> vector<224x4xbf16>
    %c0_18 = arith.constant 0 : index
    %c0_19 = arith.constant 0 : index
    %c1_20 = arith.constant 1 : index
    %c0_21 = arith.constant 0 : index
    %c0_22 = arith.constant 0 : index
    %9 = vector.load %arg1[%c0_18, %c0_19, %c1_20, %c0_21, %c0_22] : memref<1x2x2x72x4xbf16, #tpu.memory_space<vmem>>, vector<1x1x1x56x4xbf16>
    %10 = vector.shape_cast %9 : vector<1x1x1x56x4xbf16> to vector<56x4xbf16>
    %c0_23 = arith.constant 0 : index
    %c0_24 = arith.constant 0 : index
    %c0_25 = arith.constant 0 : index
    %c1_26 = arith.constant 1 : index
    %c0_27 = arith.constant 0 : index
    %11 = vector.load %arg1[%c0_23, %c0_24, %c0_25, %c1_26, %c0_27] : memref<1x2x2x72x4xbf16, #tpu.memory_space<vmem>>, vector<1x1x1x56x4xbf16>
    %12 = vector.shape_cast %11 : vector<1x1x1x56x4xbf16> to vector<56x4xbf16>
    %c0_28 = arith.constant 0 : index
    %c1_29 = arith.constant 1 : index
    %c1_30 = arith.constant 1 : index
    %c0_31 = arith.constant 0 : index
    %c0_32 = arith.constant 0 : index
    %13 = vector.load %arg1[%c0_28, %c1_29, %c1_30, %c0_31, %c0_32] : memref<1x2x2x72x4xbf16, #tpu.memory_space<vmem>>, vector<1x1x1x56x4xbf16>
    %14 = vector.shape_cast %13 : vector<1x1x1x56x4xbf16> to vector<56x4xbf16>
    %c0_33 = arith.constant 0 : index
    %c1_34 = arith.constant 1 : index
    %c0_35 = arith.constant 0 : index
    %c1_36 = arith.constant 1 : index
    %c0_37 = arith.constant 0 : index
    %15 = vector.load %arg1[%c0_33, %c1_34, %c0_35, %c1_36, %c0_37] : memref<1x2x2x72x4xbf16, #tpu.memory_space<vmem>>, vector<1x1x1x56x4xbf16>
    %16 = vector.shape_cast %15 : vector<1x1x1x56x4xbf16> to vector<56x4xbf16>
    %17 = tpu.concatenate %10, %12, %14, %16 in 0 : vector<56x4xbf16>, vector<56x4xbf16>, vector<56x4xbf16>, vector<56x4xbf16> -> vector<224x4xbf16>
    %c0_38 = arith.constant 0 : index
    %c0_39 = arith.constant 0 : index
    %c0_40 = arith.constant 0 : index
    %c1_41 = arith.constant 1 : index
    %c0_42 = arith.constant 0 : index
    %18 = vector.load %arg1[%c0_38, %c0_39, %c0_40, %c1_41, %c0_42] : memref<1x2x2x72x4xbf16, #tpu.memory_space<vmem>>, vector<1x1x1x56x4xbf16>
    %19 = vector.shape_cast %18 : vector<1x1x1x56x4xbf16> to vector<56x4xbf16>
    %c0_43 = arith.constant 0 : index
    %c0_44 = arith.constant 0 : index
    %c1_45 = arith.constant 1 : index
    %c1_46 = arith.constant 1 : index
    %c0_47 = arith.constant 0 : index
    %20 = vector.load %arg1[%c0_43, %c0_44, %c1_45, %c1_46, %c0_47] : memref<1x2x2x72x4xbf16, #tpu.memory_space<vmem>>, vector<1x1x1x56x4xbf16>
    %21 = vector.shape_cast %20 : vector<1x1x1x56x4xbf16> to vector<56x4xbf16>
    %c0_48 = arith.constant 0 : index
    %c1_49 = arith.constant 1 : index
    %c0_50 = arith.constant 0 : index
    %c1_51 = arith.constant 1 : index
    %c0_52 = arith.constant 0 : index
    %22 = vector.load %arg1[%c0_48, %c1_49, %c0_50, %c1_51, %c0_52] : memref<1x2x2x72x4xbf16, #tpu.memory_space<vmem>>, vector<1x1x1x56x4xbf16>
    %23 = vector.shape_cast %22 : vector<1x1x1x56x4xbf16> to vector<56x4xbf16>
    %c0_53 = arith.constant 0 : index
    %c1_54 = arith.constant 1 : index
    %c1_55 = arith.constant 1 : index
    %c1_56 = arith.constant 1 : index
    %c0_57 = arith.constant 0 : index
    %24 = vector.load %arg1[%c0_53, %c1_54, %c1_55, %c1_56, %c0_57] : memref<1x2x2x72x4xbf16, #tpu.memory_space<vmem>>, vector<1x1x1x56x4xbf16>
    %25 = vector.shape_cast %24 : vector<1x1x1x56x4xbf16> to vector<56x4xbf16>
    %26 = tpu.concatenate %19, %21, %23, %25 in 0 : vector<56x4xbf16>, vector<56x4xbf16>, vector<56x4xbf16>, vector<56x4xbf16> -> vector<224x4xbf16>
    %c0_58 = arith.constant 0 : index
    %c1_59 = arith.constant 1 : index
    %c0_60 = arith.constant 0 : index
    %c0_61 = arith.constant 0 : index
    %c0_62 = arith.constant 0 : index
    %27 = vector.load %arg1[%c0_58, %c1_59, %c0_60, %c0_61, %c0_62] : memref<1x2x2x72x4xbf16, #tpu.memory_space<vmem>>, vector<1x1x1x56x4xbf16>
    %28 = vector.shape_cast %27 : vector<1x1x1x56x4xbf16> to vector<56x4xbf16>
    %c0_63 = arith.constant 0 : index
    %c1_64 = arith.constant 1 : index
    %c1_65 = arith.constant 1 : index
    %c0_66 = arith.constant 0 : index
    %c0_67 = arith.constant 0 : index
    %29 = vector.load %arg1[%c0_63, %c1_64, %c1_65, %c0_66, %c0_67] : memref<1x2x2x72x4xbf16, #tpu.memory_space<vmem>>, vector<1x1x1x56x4xbf16>
    %30 = vector.shape_cast %29 : vector<1x1x1x56x4xbf16> to vector<56x4xbf16>
    %c0_68 = arith.constant 0 : index
    %c0_69 = arith.constant 0 : index
    %c0_70 = arith.constant 0 : index
    %c8 = arith.constant 8 : index
    %c0_71 = arith.constant 0 : index
    %31 = vector.load %arg1[%c0_68, %c0_69, %c0_70, %c8, %c0_71] : memref<1x2x2x72x4xbf16, #tpu.memory_space<vmem>>, vector<1x1x1x56x4xbf16>
    %32 = vector.shape_cast %31 : vector<1x1x1x56x4xbf16> to vector<56x4xbf16>
    %c0_72 = arith.constant 0 : index
    %c0_73 = arith.constant 0 : index
    %c1_74 = arith.constant 1 : index
    %c8_75 = arith.constant 8 : index
    %c0_76 = arith.constant 0 : index
    %33 = vector.load %arg1[%c0_72, %c0_73, %c1_74, %c8_75, %c0_76] : memref<1x2x2x72x4xbf16, #tpu.memory_space<vmem>>, vector<1x1x1x56x4xbf16>
    %34 = vector.shape_cast %33 : vector<1x1x1x56x4xbf16> to vector<56x4xbf16>
    %35 = tpu.concatenate %28, %30, %32, %34 in 0 : vector<56x4xbf16>, vector<56x4xbf16>, vector<56x4xbf16>, vector<56x4xbf16> -> vector<224x4xbf16>
    %c0_77 = arith.constant 0 : index
    %c1_78 = arith.constant 1 : index
    %c1_79 = arith.constant 1 : index
    %c0_80 = arith.constant 0 : index
    %c0_81 = arith.constant 0 : index
    %36 = vector.load %arg1[%c0_77, %c1_78, %c1_79, %c0_80, %c0_81] : memref<1x2x2x72x4xbf16, #tpu.memory_space<vmem>>, vector<1x1x1x56x4xbf16>
    %37 = vector.shape_cast %36 : vector<1x1x1x56x4xbf16> to vector<56x4xbf16>
    %c0_82 = arith.constant 0 : index
    %c1_83 = arith.constant 1 : index
    %c0_84 = arith.constant 0 : index
    %c1_85 = arith.constant 1 : index
    %c0_86 = arith.constant 0 : index
    %38 = vector.load %arg1[%c0_82, %c1_83, %c0_84, %c1_85, %c0_86] : memref<1x2x2x72x4xbf16, #tpu.memory_space<vmem>>, vector<1x1x1x56x4xbf16>
    %39 = vector.shape_cast %38 : vector<1x1x1x56x4xbf16> to vector<56x4xbf16>
    %c0_87 = arith.constant 0 : index
    %c0_88 = arith.constant 0 : index
    %c1_89 = arith.constant 1 : index
    %c8_90 = arith.constant 8 : index
    %c0_91 = arith.constant 0 : index
    %40 = vector.load %arg1[%c0_87, %c0_88, %c1_89, %c8_90, %c0_91] : memref<1x2x2x72x4xbf16, #tpu.memory_space<vmem>>, vector<1x1x1x56x4xbf16>
    %41 = vector.shape_cast %40 : vector<1x1x1x56x4xbf16> to vector<56x4xbf16>
    %c0_92 = arith.constant 0 : index
    %c0_93 = arith.constant 0 : index
    %c0_94 = arith.constant 0 : index
    %c9 = arith.constant 9 : index
    %c0_95 = arith.constant 0 : index
    %42 = vector.load %arg1[%c0_92, %c0_93, %c0_94, %c9, %c0_95] : memref<1x2x2x72x4xbf16, #tpu.memory_space<vmem>>, vector<1x1x1x56x4xbf16>
    %43 = vector.shape_cast %42 : vector<1x1x1x56x4xbf16> to vector<56x4xbf16>
    %44 = tpu.concatenate %37, %39, %41, %43 in 0 : vector<56x4xbf16>, vector<56x4xbf16>, vector<56x4xbf16>, vector<56x4xbf16> -> vector<224x4xbf16>
    %c0_96 = arith.constant 0 : index
    %c1_97 = arith.constant 1 : index
    %c0_98 = arith.constant 0 : index
    %c1_99 = arith.constant 1 : index
    %c0_100 = arith.constant 0 : index
    %45 = vector.load %arg1[%c0_96, %c1_97, %c0_98, %c1_99, %c0_100] : memref<1x2x2x72x4xbf16, #tpu.memory_space<vmem>>, vector<1x1x1x56x4xbf16>
    %46 = vector.shape_cast %45 : vector<1x1x1x56x4xbf16> to vector<56x4xbf16>
    %c0_101 = arith.constant 0 : index
    %c1_102 = arith.constant 1 : index
    %c1_103 = arith.constant 1 : index
    %c1_104 = arith.constant 1 : index
    %c0_105 = arith.constant 0 : index
    %47 = vector.load %arg1[%c0_101, %c1_102, %c1_103, %c1_104, %c0_105] : memref<1x2x2x72x4xbf16, #tpu.memory_space<vmem>>, vector<1x1x1x56x4xbf16>
    %48 = vector.shape_cast %47 : vector<1x1x1x56x4xbf16> to vector<56x4xbf16>
    %c0_106 = arith.constant 0 : index
    %c0_107 = arith.constant 0 : index
    %c0_108 = arith.constant 0 : index
    %c9_109 = arith.constant 9 : index
    %c0_110 = arith.constant 0 : index
    %49 = vector.load %arg1[%c0_106, %c0_107, %c0_108, %c9_109, %c0_110] : memref<1x2x2x72x4xbf16, #tpu.memory_space<vmem>>, vector<1x1x1x56x4xbf16>
    %50 = vector.shape_cast %49 : vector<1x1x1x56x4xbf16> to vector<56x4xbf16>
    %c0_111 = arith.constant 0 : index
    %c0_112 = arith.constant 0 : index
    %c1_113 = arith.constant 1 : index
    %c9_114 = arith.constant 9 : index
    %c0_115 = arith.constant 0 : index
    %51 = vector.load %arg1[%c0_111, %c0_112, %c1_113, %c9_114, %c0_115] : memref<1x2x2x72x4xbf16, #tpu.memory_space<vmem>>, vector<1x1x1x56x4xbf16>
    %52 = vector.shape_cast %51 : vector<1x1x1x56x4xbf16> to vector<56x4xbf16>
    %53 = tpu.concatenate %46, %48, %50, %52 in 0 : vector<56x4xbf16>, vector<56x4xbf16>, vector<56x4xbf16>, vector<56x4xbf16> -> vector<224x4xbf16>
    %c0_116 = arith.constant 0 : index
    %c0_117 = arith.constant 0 : index
    %c0_118 = arith.constant 0 : index
    %c8_119 = arith.constant 8 : index
    %c0_120 = arith.constant 0 : index
    %54 = vector.load %arg1[%c0_116, %c0_117, %c0_118, %c8_119, %c0_120] : memref<1x2x2x72x4xbf16, #tpu.memory_space<vmem>>, vector<1x1x1x56x4xbf16>
    %55 = vector.shape_cast %54 : vector<1x1x1x56x4xbf16> to vector<56x4xbf16>
    %c0_121 = arith.constant 0 : index
    %c0_122 = arith.constant 0 : index
    %c1_123 = arith.constant 1 : index
    %c8_124 = arith.constant 8 : index
    %c0_125 = arith.constant 0 : index
    %56 = vector.load %arg1[%c0_121, %c0_122, %c1_123, %c8_124, %c0_125] : memref<1x2x2x72x4xbf16, #tpu.memory_space<vmem>>, vector<1x1x1x56x4xbf16>
    %57 = vector.shape_cast %56 : vector<1x1x1x56x4xbf16> to vector<56x4xbf16>
    %c0_126 = arith.constant 0 : index
    %c1_127 = arith.constant 1 : index
    %c0_128 = arith.constant 0 : index
    %c8_129 = arith.constant 8 : index
    %c0_130 = arith.constant 0 : index
    %58 = vector.load %arg1[%c0_126, %c1_127, %c0_128, %c8_129, %c0_130] : memref<1x2x2x72x4xbf16, #tpu.memory_space<vmem>>, vector<1x1x1x56x4xbf16>
    %59 = vector.shape_cast %58 : vector<1x1x1x56x4xbf16> to vector<56x4xbf16>
    %c0_131 = arith.constant 0 : index
    %c1_132 = arith.constant 1 : index
    %c1_133 = arith.constant 1 : index
    %c8_134 = arith.constant 8 : index
    %c0_135 = arith.constant 0 : index
    %60 = vector.load %arg1[%c0_131, %c1_132, %c1_133, %c8_134, %c0_135] : memref<1x2x2x72x4xbf16, #tpu.memory_space<vmem>>, vector<1x1x1x56x4xbf16>
    %61 = vector.shape_cast %60 : vector<1x1x1x56x4xbf16> to vector<56x4xbf16>
    %62 = tpu.concatenate %55, %57, %59, %61 in 0 : vector<56x4xbf16>, vector<56x4xbf16>, vector<56x4xbf16>, vector<56x4xbf16> -> vector<224x4xbf16>
    %c0_136 = arith.constant 0 : index
    %c0_137 = arith.constant 0 : index
    %c1_138 = arith.constant 1 : index
    %c8_139 = arith.constant 8 : index
    %c0_140 = arith.constant 0 : index
    %63 = vector.load %arg1[%c0_136, %c0_137, %c1_138, %c8_139, %c0_140] : memref<1x2x2x72x4xbf16, #tpu.memory_space<vmem>>, vector<1x1x1x56x4xbf16>
    %64 = vector.shape_cast %63 : vector<1x1x1x56x4xbf16> to vector<56x4xbf16>
    %c0_141 = arith.constant 0 : index
    %c0_142 = arith.constant 0 : index
    %c0_143 = arith.constant 0 : index
    %c9_144 = arith.constant 9 : index
    %c0_145 = arith.constant 0 : index
    %65 = vector.load %arg1[%c0_141, %c0_142, %c0_143, %c9_144, %c0_145] : memref<1x2x2x72x4xbf16, #tpu.memory_space<vmem>>, vector<1x1x1x56x4xbf16>
    %66 = vector.shape_cast %65 : vector<1x1x1x56x4xbf16> to vector<56x4xbf16>
    %c0_146 = arith.constant 0 : index
    %c1_147 = arith.constant 1 : index
    %c1_148 = arith.constant 1 : index
    %c8_149 = arith.constant 8 : index
    %c0_150 = arith.constant 0 : index
    %67 = vector.load %arg1[%c0_146, %c1_147, %c1_148, %c8_149, %c0_150] : memref<1x2x2x72x4xbf16, #tpu.memory_space<vmem>>, vector<1x1x1x56x4xbf16>
    %68 = vector.shape_cast %67 : vector<1x1x1x56x4xbf16> to vector<56x4xbf16>
    %c0_151 = arith.constant 0 : index
    %c1_152 = arith.constant 1 : index
    %c0_153 = arith.constant 0 : index
    %c9_154 = arith.constant 9 : index
    %c0_155 = arith.constant 0 : index
    %69 = vector.load %arg1[%c0_151, %c1_152, %c0_153, %c9_154, %c0_155] : memref<1x2x2x72x4xbf16, #tpu.memory_space<vmem>>, vector<1x1x1x56x4xbf16>
    %70 = vector.shape_cast %69 : vector<1x1x1x56x4xbf16> to vector<56x4xbf16>
    %71 = tpu.concatenate %64, %66, %68, %70 in 0 : vector<56x4xbf16>, vector<56x4xbf16>, vector<56x4xbf16>, vector<56x4xbf16> -> vector<224x4xbf16>
    %c0_156 = arith.constant 0 : index
    %c0_157 = arith.constant 0 : index
    %c0_158 = arith.constant 0 : index
    %c9_159 = arith.constant 9 : index
    %c0_160 = arith.constant 0 : index
    %72 = vector.load %arg1[%c0_156, %c0_157, %c0_158, %c9_159, %c0_160] : memref<1x2x2x72x4xbf16, #tpu.memory_space<vmem>>, vector<1x1x1x56x4xbf16>
    %73 = vector.shape_cast %72 : vector<1x1x1x56x4xbf16> to vector<56x4xbf16>
    %c0_161 = arith.constant 0 : index
    %c0_162 = arith.constant 0 : index
    %c1_163 = arith.constant 1 : index
    %c9_164 = arith.constant 9 : index
    %c0_165 = arith.constant 0 : index
    %74 = vector.load %arg1[%c0_161, %c0_162, %c1_163, %c9_164, %c0_165] : memref<1x2x2x72x4xbf16, #tpu.memory_space<vmem>>, vector<1x1x1x56x4xbf16>
    %75 = vector.shape_cast %74 : vector<1x1x1x56x4xbf16> to vector<56x4xbf16>
    %c0_166 = arith.constant 0 : index
    %c1_167 = arith.constant 1 : index
    %c0_168 = arith.constant 0 : index
    %c9_169 = arith.constant 9 : index
    %c0_170 = arith.constant 0 : index
    %76 = vector.load %arg1[%c0_166, %c1_167, %c0_168, %c9_169, %c0_170] : memref<1x2x2x72x4xbf16, #tpu.memory_space<vmem>>, vector<1x1x1x56x4xbf16>
    %77 = vector.shape_cast %76 : vector<1x1x1x56x4xbf16> to vector<56x4xbf16>
    %c0_171 = arith.constant 0 : index
    %c1_172 = arith.constant 1 : index
    %c1_173 = arith.constant 1 : index
    %c9_174 = arith.constant 9 : index
    %c0_175 = arith.constant 0 : index
    %78 = vector.load %arg1[%c0_171, %c1_172, %c1_173, %c9_174, %c0_175] : memref<1x2x2x72x4xbf16, #tpu.memory_space<vmem>>, vector<1x1x1x56x4xbf16>
    %79 = vector.shape_cast %78 : vector<1x1x1x56x4xbf16> to vector<56x4xbf16>
    %80 = tpu.concatenate %73, %75, %77, %79 in 0 : vector<56x4xbf16>, vector<56x4xbf16>, vector<56x4xbf16>, vector<56x4xbf16> -> vector<224x4xbf16>
    %81 = tpu.concatenate %8, %17, %26, %35, %44, %53, %62, %71, %80 in 1 : vector<224x4xbf16>, vector<224x4xbf16>, vector<224x4xbf16>, vector<224x4xbf16>, vector<224x4xbf16>, vector<224x4xbf16>, vector<224x4xbf16>, vector<224x4xbf16>, vector<224x4xbf16> -> vector<224x36xbf16>
    %c0_176 = arith.constant 0 : index
    %c0_177 = arith.constant 0 : index
    %82 = vector.load %arg2[%c0_176, %c0_177] : memref<36x8xbf16, #tpu.memory_space<vmem>>, vector<36x8xbf16>
    %cst = arith.constant dense<0.000000e+00> : vector<224x8xf32>
    %83 = tpu.matmul %81, %82, %cst {dimension_numbers = #tpu.dot_dimension_numbers<[1], [0], [0], [1], [0, 0, 1, 1], [], []>} : vector<224x36xbf16>, vector<36x8xbf16>, vector<224x8xf32> -> vector<224x8xf32>
    %84 = vector.extract_strided_slice %83 {offsets = [0, 0], sizes = [56, 8], strides = [1, 1]} : vector<224x8xf32> to vector<56x8xf32>
    %85 = vector.extract_strided_slice %83 {offsets = [56, 0], sizes = [56, 8], strides = [1, 1]} : vector<224x8xf32> to vector<56x8xf32>
    %86 = arith.maximumf %84, %85 : vector<56x8xf32>
    %87 = vector.extract_strided_slice %83 {offsets = [112, 0], sizes = [56, 8], strides = [1, 1]} : vector<224x8xf32> to vector<56x8xf32>
    %88 = arith.maximumf %86, %87 : vector<56x8xf32>
    %89 = vector.extract_strided_slice %83 {offsets = [168, 0], sizes = [56, 8], strides = [1, 1]} : vector<224x8xf32> to vector<56x8xf32>
    %90 = arith.maximumf %88, %89 : vector<56x8xf32>
    %c0_178 = arith.constant 0 : index
    %c0_179 = arith.constant 0 : index
    %91 = vector.load %arg3[%c0_178, %c0_179] : memref<1x8xf32, #tpu.memory_space<vmem>>, vector<1x8xf32>
    %92 = vector.broadcast %91 : vector<1x8xf32> to vector<56x8xf32>
    %93 = arith.addf %90, %92 : vector<56x8xf32>
    %cst_180 = arith.constant 0.000000e+00 : f32
    %94 = vector.broadcast %cst_180 : f32 to vector<56x8xf32>
    %95 = arith.maximumf %93, %94 : vector<56x8xf32>
    %c0_181 = arith.constant 0 : index
    %c0_182 = arith.constant 0 : index
    %c0_183 = arith.constant 0 : index
    %96 = vector.load %arg4[%c0_181, %c0_182, %c0_183] : memref<1x56x8xf32, #tpu.memory_space<vmem>>, vector<1x56x8xf32>
    %97 = vector.shape_cast %96 : vector<1x56x8xf32> to vector<56x8xf32>
    %98 = vector.shape_cast %95 : vector<56x8xf32> to vector<1x56x8xf32>
    tpu.vector_store %arg4[%c0_181, %c0_182, %c0_183], %98 {strides = array<i32>} : memref<1x56x8xf32, #tpu.memory_space<vmem>>, vector<1x56x8xf32>,
    %99 = tpu.iota {dimensions = array<i32: 0>} : vector<56x8xi32>
    %c8_i32 = arith.constant 8 : i32
    %c0_i32 = arith.constant 0 : i32
    %100 = arith.cmpi eq, %c8_i32, %c0_i32 : i32
    %c1_i32 = arith.constant 1 : i32
    %101 = arith.select %100, %c1_i32, %c8_i32 : i32
    %102 = vector.broadcast %101 : i32 to vector<56x8xi32>
    %103 = arith.remsi %99, %102 : vector<56x8xi32>
    %c0_i32_184 = arith.constant 0 : i32
    %104 = vector.broadcast %c0_i32_184 : i32 to vector<56x8xi32>
    %105 = arith.cmpi ne, %103, %104 : vector<56x8xi32>
    %c0_i32_185 = arith.constant 0 : i32
    %106 = vector.broadcast %c0_i32_185 : i32 to vector<56x8xi32>
    %107 = arith.cmpi slt, %103, %106 : vector<56x8xi32>
    %c0_i32_186 = arith.constant 0 : i32
    %108 = arith.cmpi slt, %101, %c0_i32_186 : i32
    %109 = vector.broadcast %108 : i1 to vector<56x8xi1>
    %110 = vector.broadcast %109 : vector<56x8xi1> to vector<56x8xi1>
    %111 = arith.xori %107, %110 : vector<56x8xi1>
    %112 = arith.andi %111, %105 : vector<56x8xi1>
    %113 = vector.broadcast %101 : i32 to vector<56x8xi32>
    %114 = arith.addi %103, %113 : vector<56x8xi32>
    %115 = arith.select %112, %114, %103 : vector<56x8xi1>, vector<56x8xi32>
    %c7_i32 = arith.constant 7 : i32
    %116 = vector.broadcast %c7_i32 : i32 to vector<56x8xi32>
    %117 = arith.cmpi slt, %115, %116 : vector<56x8xi32>
    %cst_187 = arith.constant 0.000000e+00 : f32
    %118 = vector.broadcast %cst_187 : f32 to vector<56x8xf32>
    %119 = arith.select %117, %95, %118 : vector<56x8xi1>, vector<56x8xf32>
    %cst_188 = arith.constant dense<0.000000e+00> : vector<8xf32>
    %120 = vector.multi_reduction <add>, %119, %cst_188 [0] : vector<56x8xf32> to vector<8xf32>
    %121 = vector.shape_cast %120 : vector<8xf32> to vector<1x8xf32>
    %c0_189 = arith.constant 0 : index
    %c0_190 = arith.constant 0 : index
    %c0_191 = arith.constant 0 : index
    %122 = vector.load %arg5[%c0_189, %c0_190, %c0_191] : memref<1x1x8xf32, #tpu.memory_space<vmem>>, vector<1x1x8xf32>
    %123 = vector.shape_cast %122 : vector<1x1x8xf32> to vector<1x8xf32>
    %124 = vector.shape_cast %121 : vector<1x8xf32> to vector<1x1x8xf32>
    tpu.vector_store %arg5[%c0_189, %c0_190, %c0_191], %124 {strides = array<i32>} : memref<1x1x8xf32, #tpu.memory_space<vmem>>, vector<1x1x8xf32>,
    %125 = arith.mulf %119, %119 : vector<56x8xf32>
    %cst_192 = arith.constant dense<0.000000e+00> : vector<8xf32>
    %126 = vector.multi_reduction <add>, %125, %cst_192 [0] : vector<56x8xf32> to vector<8xf32>
    %127 = vector.shape_cast %126 : vector<8xf32> to vector<1x8xf32>
    %c0_193 = arith.constant 0 : index
    %c0_194 = arith.constant 0 : index
    %c0_195 = arith.constant 0 : index
    %128 = vector.load %arg6[%c0_193, %c0_194, %c0_195] : memref<1x1x8xf32, #tpu.memory_space<vmem>>, vector<1x1x8xf32>
    %129 = vector.shape_cast %128 : vector<1x1x8xf32> to vector<1x8xf32>
    %130 = vector.shape_cast %127 : vector<1x8xf32> to vector<1x1x8xf32>
    tpu.vector_store %arg6[%c0_193, %c0_194, %c0_195], %130 {strides = array<i32>} : memref<1x1x8xf32, #tpu.memory_space<vmem>>, vector<1x1x8xf32>,
    return
  }
  func.func @transform_0(%arg0: i32) -> (i32, i32, i32, i32, i32) {
    %c0_i32 = arith.constant 0 : i32
    %c0_i32_0 = arith.constant 0 : i32
    %c0_i32_1 = arith.constant 0 : i32
    %c0_i32_2 = arith.constant 0 : i32
    %c0_i32_3 = arith.constant 0 : i32
    return %arg0, %c0_i32, %c0_i32_0, %c0_i32_1, %c0_i32_2 : i32, i32, i32, i32, i32
  }
  func.func @transform_1(%arg0: i32) -> (i32, i32) {
    %c0_i32 = arith.constant 0 : i32
    %c0_i32_0 = arith.constant 0 : i32
    %c0_i32_1 = arith.constant 0 : i32
    return %c0_i32, %c0_i32_0 : i32, i32
  }
  func.func @transform_2(%arg0: i32) -> (i32, i32) {
    %c0_i32 = arith.constant 0 : i32
    %c0_i32_0 = arith.constant 0 : i32
    %c0_i32_1 = arith.constant 0 : i32
    return %c0_i32, %c0_i32_0 : i32, i32
  }
  func.func @transform_3(%arg0: i32) -> (i32, i32, i32) {
    %c0_i32 = arith.constant 0 : i32
    %c0_i32_0 = arith.constant 0 : i32
    %c0_i32_1 = arith.constant 0 : i32
    return %arg0, %c0_i32, %c0_i32_0 : i32, i32, i32
  }
  func.func @transform_4(%arg0: i32) -> (i32, i32, i32) {
    %c0_i32 = arith.constant 0 : i32
    %c0_i32_0 = arith.constant 0 : i32
    %c0_i32_1 = arith.constant 0 : i32
    return %arg0, %c0_i32, %c0_i32_0 : i32, i32, i32
  }
  func.func @transform_5(%arg0: i32) -> (i32, i32, i32) {
    %c0_i32 = arith.constant 0 : i32
    %c0_i32_0 = arith.constant 0 : i32
    %c0_i32_1 = arith.constant 0 : i32
    return %arg0, %c0_i32, %c0_i32_0 : i32, i32, i32
  }
}

</mosaic_0001>

<bundles_post_ra>
// kernel: tpu_custom_call.1
= control target key start
LH: loop header
LB: loop body
LE: loop exit
PB: predicated region body
PF: predicated region fallthrough
CT: control target
= control target key end

     0   :  { %11 = vsyncpa [#allocation3], 0  ;;  %s3337_s0 = inlined_call_operand.vmem [shape: bf16[2,2,2,72,4], index: 0, kind: input, shape index: {}]   ;;  %s3338_s1 = inlined_call_operand.vmem [shape: bf16[36,8], index: 1, kind: input, shape index: {}]   ;;  %s3339_s2 = inlined_call_operand.vmem [shape: f32[1,8], index: 2, kind: input, shape index: {}]   ;;  %s3340_s3 = inlined_call_operand.vmem [shape: f32[2,56,8], index: 3, kind: output, shape index: {0}]   ;;  %s3341_s4 = inlined_call_operand.hbm [shape: f32[2,1,8], index: 4, kind: output, shape index: {1}]   ;;  %s3342_s5 = inlined_call_operand.hbm [shape: f32[2,1,8], index: 5, kind: output, shape index: {2}]  }
   0x1   :  { %13 = vsyncpa [#allocation3 + $0x1], 0 }
   0x2   :  { %14 = vsyncpa [#allocation5], 0 }
   0x3   :  { %16 = vsyncpa [#allocation5 + $0x1], 0  ;;  %s2193_s18 = smov 0   ;;  %s2195_s19 = smov 0  }
   0x4   :  { %s2197_s20 = smov 0   ;;  %s2199_s21 = smov 0  }
   0x5 LB: > { %s2214_s22 = sadd.s32 4294967295, %s2151_s21   ;;  %s1791_s23 = sadd.s32 4294967294, %s2151_s21   ;;  %s2151_s21 = sphi %s2199_s21, %s3460_s21   ;;  %s2147_s20 = sphi %s2197_s20, %s3459_s20   ;;  %s2143_s19 = sphi %s2195_s19, %s3458_s19   ;;  %s2139_s18 = sphi %s2193_s18, %s3457_s18  }
   0x6   : > { %s2218_s24 = sadd.s32 1, %s2151_s21   ;;  %s123_s25 = sadd.s32 1, %s2147_s20 }
   0x7   : > { %s120_s26 = ssub.s32 %s2151_s21, %s2218_s24  ;;  %p133_p0 = scmp.ne.s32.totalorder %s2147_s20, %s2143_s19 }
   0x8   : > { %p121_p1 = scmp.eq.s32.totalorder %s120_s26, 0  ;;  %p134_p2 = scmp.eq.s32.totalorder %s2214_s22, 1 }
   0x9   : > { %p139_p3 = scmp.ne.s32.totalorder %s2143_s19, %s2139_s18  ;;  %p140_p4 = scmp.eq.s32.totalorder %s1791_s23, 1 }
   0xa   : > { %s2229_s27 = scalar_select %p121_p1, %s2147_s20, %s123_s25  }
   0xb   : > { %p2231_p5 = por %p134_p2, %p133_p0  ;;  %p2235_p6 = por %p140_p4, %p139_p3 }
   0xc   : > { %p1794_p7 = scmp.ge.s32.totalorder %s2151_s21, 1  ;;  %p198_p8 = scmp.lt.s32.totalorder %s2151_s21, 3 }
   0xe   : > { %p199_p9 = pnand %p1794_p7, %p198_p8 }
  0x10   : > { %202 = sbr.rel (%p199_p9) target bundleno = 650 (0x28a), region = 32 }
  0x17   : > { %p234_p10 = scmp.lt.s32.totalorder %s2214_s22, 1  ;;  %s2153_s10 = smov 12   ;;  %vm450_vm0 = vsmask.f32 7424  ;;  %v2044_v51 = vld [vmem:[%s3338_s1] sm:$0xff]   ;;  %v2046_v57 = vld [vmem:[%s3338_s1 + $0x8] sm:$0xff]  }
  0x18   : > { %s2154_s11 = smov 4   ;;  %s2155_s12 = smov 16   ;;  %1912 = vmatprep.subr.bf16.mxu0 %v2044_v51  ;;  %1946 = vmatprep.subr.bf16.mxu1 %v2044_v51  ;;  %vm348_vm1 = vcmask 1043456   ;;  %vm364_vm2 = vsmask.f32 3328  ;;  %vm1293_vm3 = vcmask 1041408  }
  0x19   : > { %s2243_s30 = scalar_select %p234_p10, %s2214_s22, 1  ;;  %1913 = vmatpush3.bf16.msra.mxu0 %v2044_v51  ;;  %1949 = vmatpush3.bf16.msra.mxu1 %v2044_v51  ;;  %vm1012_vm4 = vcmask 31744   ;;  %vm1041_vm5 = vcmask 64512   ;;  %vm1070_vm6 = vcmask 97280   ;;  %vm1099_vm7 = vcmask 130048  }
  0x1a   : > { %s2156_s13 = smov 8   ;;  %1914 = vmatprep.subr.bf16.mxu0 %v2046_v57  ;;  %s2157_s23 = smov 20   ;;  %1947 = vmatprep.subr.bf16.mxu1 %v2046_v57  ;;  %vm1128_vm8 = vcmask 162816   ;;  %vm1157_vm9 = vcmask 195584   ;;  %vm1186_vm10 = vcmask 228352   ;;  %vm1215_vm11 = vcmask 261120  }
  0x1b   : > { %s1954_s6 = smul.u32 144, %s2243_s30  ;;  %s2158_s25 = smov 24   ;;  %vm1264_vm12 = vcmask 293888  }
  0x1c   : > { %s2159_s26 = smov 28   ;;  %s1891_s15 = sshll.u32 %s2214_s22, 4 }
  0x1d   : > { %s2249_s9 = scalar_lea.vmem %s3337_s0, %s1954_s6  ;;  %1915 = vmatpush3.bf16.msra.mxu0 %v2046_v57  ;;  %1950 = vmatpush3.bf16.msra.mxu1 %v2046_v57  ;;  %s2160_s6 = smov 32  }
  0x1e   : > { %v1806_v0 = vld [vmem:[%s2249_s9 + $0x50] sm:$0xf]  ;;  %v2253_v1 = vld [vmem:[%s2249_s9 + $0x54] sm:$0xf]  ;;  %v2256_v2 = vld [vmem:[%s2249_s9 + $0x24] sm:$0xf]  ;;  %s3261_s7 = scalar_lea.hbm %s3341_s4, %s1891_s15 }
  0x1f   : > { %v2259_v3 = vcombine.low %v1806_v0, %v2253_v1  ;;  %v2262_v4 = vld [vmem:[%s2249_s9 + $0x28] sm:$0xf]  ;;  %v2265_v5 = vld [vmem:[%s2249_s9 + $0x2c] sm:$0xf]  ;;  %v2268_v6 = vld [vmem:[%s2249_s9 + $0x30] sm:$0xf] }
  0x20   : > { %v2272_v7 = vcombine.low %v2256_v2, %v2262_v4  ;;  %v2275_v8 = vld [vmem:[%s2249_s9 + $0x74] sm:$0xf]  ;;  %v2278_v9 = vld [vmem:[%s2249_s9 + $0x78] sm:$0xf]  ;;  %v1804_v10 = vld [vmem:[%s2249_s9 + $0x48] sm:$0xf]  ;;  %v2292_v15 = vcombine.low %v2265_v5, %v2268_v6 }
  0x21   : > { %3384 = vst [vmem:[#allocation8_spill] sm:$0xff] %v2259_v3  ;;  %841 = vrot.lane.b32.xlu1 %v2259_v3, %s2153_s10  ;;  %v2285_v11 = vcombine.low %v2275_v8, %v2278_v9  ;;  %v1805_v12 = vld [vmem:[%s2249_s9 + $0x4c] sm:$0xf]  ;;  %v245_v13 = vld [vmem:[%s2249_s9] sm:$0xf]  ;;  %v419_v33 = vshll.u32 %v2259_v3, 16 }
  0x22   : > { %v246_v14 = vld [vmem:[%s2249_s9 + $0x4] sm:$0xf]  ;;  %779 = vrot.lane.b32.xlu0 %v2272_v7, %s2154_s11  ;;  %v2296_v16 = vcombine.low %v1804_v10, %v1805_v12  ;;  %v2298_v17 = vcombine.low %v1805_v12, %v1806_v0  ;;  %v247_v18 = vld [vmem:[%s2249_s9 + $0x8] sm:$0xf]  ;;  %v248_v19 = vld [vmem:[%s2249_s9 + $0xc] sm:$0xf] }
  0x23   : > { %v2302_v20 = vcombine.low %v245_v13, %v246_v14  ;;  %v2304_v21 = vcombine.low %v247_v18, %v248_v19  ;;  %v249_v22 = vld [vmem:[%s2249_s9 + $0x10] sm:$0xf]  ;;  %v250_v23 = vld [vmem:[%s2249_s9 + $0x14] sm:$0xf]  ;;  %v2315_v28 = vld [vmem:[%s2249_s9 + $0x6c] sm:$0xf]  ;;  %v2365_v50 = vcombine.low %v246_v14, %v247_v18  ;;  %v2416_v14 = vcombine.low %v2262_v4, %v2265_v5 }
  0x24   : > { %3385 = vst [vmem:[#allocation9_spill] sm:$0xff] %v2296_v16  ;;  %3386 = vst [vmem:[#allocation10_spill] sm:$0xff] %v2298_v17  ;;  %v411_v24 = vshll.u32 %v2296_v16, 16  ;;  %v2317_v29 = vcombine.low %v249_v22, %v250_v23  ;;  %v2320_v30 = vld [vmem:[%s2249_s9 + $0x58] sm:$0xf]  ;;  %v408_v32 = vshrl.u32 %v2296_v16, 16  ;;  %v2396_v60 = vcombine.low %v248_v19, %v249_v22 }
  0x25   : > { %3387 = vst [vmem:[#allocation11_spill] sm:$0xff] %v2302_v20  ;;  %3388 = vst [vmem:[#allocation12_spill] sm:$0xff] %v2304_v21  ;;  %870 = vrot.lane.b32.xlu1 %v2285_v11, %s2155_s12  ;;  %v366_v25 = vshrl.u32 %v2302_v20, 16  ;;  %v369_v26 = vshll.u32 %v2302_v20, 16  ;;  %v3344_v27 = vshll.u32 %v2304_v21, 16  ;;  %v3346_v31 = vshrl.u32 %v2304_v21, 16 }
  0x26   : > { %781 = vrot.lane.b32.xlu0 %v2292_v15, %s2154_s11  ;;  %v500_v34 = vrot.slane %v411_v24, 1  ;;  %v2330_v35 = vld [vmem:[%s2249_s9 + $0x5c] sm:$0xf]  ;;  %v2337_v38 = vld [vmem:[%s2249_s9 + $0x70] sm:$0xf]  ;;  %v3343_v39 = vshll.u32 %v2317_v29, 16 }
  0x27   : > { %v451_v36 = vrot.slane %v369_v26, 1  ;;  %v453_v37 = vrot.slane %v3344_v27, 1  ;;  %v2342_v40 = vcombine.low %v2320_v30, %v2330_v35  ;;  %v502_v41 = vrot.slane %v419_v33, 1  ;;  %3391 = vst [vmem:[#allocation15_spill] sm:$0xff] %v2365_v50  ;;  %v2389_v58 = vld [vmem:[%s2249_s9 + $0x18] sm:$0xf] }
  0x28   : > { %v416_v42 = vshrl.u32 %v2259_v3, 16  ;;  %v2353_v45 = vrot.slane %v3343_v39, 1  ;;  %v2360_v47 = vcombine.low %v2315_v28, %v2337_v38  ;;  %v501_v49 = vor.u32 %v500_v34, %v408_v32  ;;  %v355_v61 = vld [vmem:[%s2249_s9 + $0x1c] sm:$0x1]  ;;  %v1801_v12 = vld [vmem:[%s2249_s9 + $0x34] sm:$0xf] }
  0x29   : > { %3389 = vst [vmem:[#allocation13_spill] sm:$0xff] %v2342_v40  ;;  %v452_v43 = vor.u32 %v451_v36, %v366_v25  ;;  %v455_v44 = vor.u32 %v453_v37, %v3346_v31  ;;  %v428_v46 = vshll.u32 %v2342_v40, 16  ;;  %v3348_v56 = vshll.u32 %v2365_v50, 16  ;;  %3393 = vst [vmem:[#allocation17_spill] sm:$0xff] %v2416_v14 }
  0x2a   : > { %839 = vrot.lane.b32.xlu0 %v2296_v16, %s2153_s10  ;;  %3390 = vst [vmem:[#allocation14_spill] sm:$0xff] %v2360_v47  ;;  %v504_v53 = vor.u32 %v502_v41, %v416_v42  ;;  %v2382_v55 = vsel %vm450_vm0, %v501_v49, %v502_v41  ;;  %v2402_v62 = vcombine.low %v250_v23, %v2389_v58  ;;  %v3349_v63 = vshrl.u32 %v2365_v50, 16 }
  0x2b   : > { %v454_v48 = vsel %vm450_vm0, %v452_v43, %v453_v37  ;;  %v457_v52 = vsel %vm450_vm0, %v455_v44, %v2353_v45  ;;  %v2377_v54 = vrot.slane %v428_v46, 1  ;;  %3392 = vst [vmem:[#allocation16_spill] sm:$0xff] %v2382_v55  ;;  %v587_v0 = vshll.u32 %v2396_v60, 16  ;;  %v2434_v37 = vld [vmem:[%s2249_s9 + $0x38] sm:$0xf] }
  0x2c   : > { %809 = vrot.lane.b32.xlu1 %v454_v48, %s2156_s13  ;;  %v614_v10 = vrot.slane %v3348_v56, 1  ;;  %v2412_v13 = vcombine.low %v2389_v58, %v355_v61  ;;  %v584_v22 = vshrl.u32 %v2396_v60, 16  ;;  %v3352_v23 = vshll.u32 %v2402_v62, 16 }
  0x2d   : > { %v2394_v59 = vsel %vm450_vm0, %v504_v53, %v2377_v54  ;;  %v616_v19 = vrot.slane %v587_v0, 1  ;;  %v466_v34 = vshrl.u32 %v2272_v7, 16  ;;  %v469_v5 = vshll.u32 %v2272_v7, 16  ;;  %v2444_v7 = vld [vmem:[%s2249_s9 + $0x3c] sm:$0xf] }
  0x2e   : > { %868 = vrot.lane.b32.xlu0 %v2360_v47, %s2155_s12  ;;  %v615_v18 = vor.u32 %v614_v10, %v3349_v63  ;;  %v2431_v36 = vcombine.low %v2268_v6, %v1801_v12  ;;  %v368_v41 = vrot.slane %v366_v25, 4  ;;  %v371_v43 = vrot.slane %v369_v26, 5  ;;  %v1834_v53 = vld [vmem:[%s2249_s9 + $0x64] sm:$0x1] }
  0x2f   : > { %v3347_v44 = vshll.u32 %v2412_v13, 16  ;;  %v618_v48 = vor.u32 %v616_v19, %v584_v22  ;;  %v2453_v25 = vrot.slane %v3352_v23, 1  ;;  %v3345_v26 = vshrl.u32 %v2317_v29, 16 }
  0x30   : > { %811 = vrot.lane.b32.xlu1 %v457_v52, %s2156_s13  ;;  %v2447_v6 = vsel %vm450_vm0, %v615_v18, %v616_v19  ;;  %v2459_v49 = vcombine.low %v1801_v12, %v2434_v37  ;;  %v468_v51 = vrot.slane %v466_v34, 4  ;;  %v471_v52 = vrot.slane %v469_v5, 5  ;;  %v1810_v19 = vld [vmem:[%s2249_s9 + $0x60] sm:$0xf] }
  0x31   : > { %3394 = vst [vmem:[#allocation18_spill] sm:$0xff] %v2447_v6  ;;  %v1838_v57 = vcombine.low %v2444_v7, %v2444_v7  ;;  %v2464_v61 = vor.u32 %v371_v43, %v368_v41  ;;  %v459_v10 = vrot.slane %v3347_v44, 1  ;;  %v3351_v18 = vshrl.u32 %v2412_v13, 16 }
  0x32   : > { %897 = vrot.lane.b32.xlu0 %v2382_v55, %s2157_s23  ;;  %v2474_v12 = vsel %vm450_vm0, %v618_v48, %v2453_v25  ;;  %v458_v34 = vor.u32 %v2353_v45, %v3345_v26  ;;  %v2479_v5 = vcombine.low %v1810_v19, %v1834_v53  ;;  %v2483_v41 = vor.u32 %v471_v52, %v468_v51 }
  0x33   : > { %v1829_v43 = vcombine.low %v1810_v19, %v1810_v19  ;;  %v2487_v39 = vcombine.low %v2337_v38, %v2275_v8  ;;  %v444_v48 = vsel %vm348_vm1, %v1838_v57, %v2464_v61  ;;  %v461_v27 = vor.u32 %v459_v10, %v3351_v18  ;;  %v2502_v8 = vld [vmem:[%s2249_s9 + $0x84] sm:$0xf] }
  0x34   : > { %899 = vrot.lane.b32.xlu1 %v2394_v59, %s2157_s23  ;;  %v418_v45 = vrot.slane %v416_v42, 4  ;;  %v421_v53 = vrot.slane %v419_v33, 5  ;;  %v1830_v51 = vcombine.low %v2315_v28, %v2315_v28  ;;  %v410_v52 = vrot.slane %v408_v32, 4 }
  0x35   : > { %v413_v57 = vrot.slane %v411_v24, 5  ;;  %v425_v42 = vshrl.u32 %v2342_v40, 16  ;;  %v460_v33 = vsel %vm450_vm0, %v458_v34, %v459_v10  ;;  %v3350_v26 = vshll.u32 %v2479_v5, 16 }
  0x36   : > { %926 = vrot.lane.b32.xlu0 %v2365_v50, %s2158_s25  ;;  %v2511_v31 = vor.u32 %v421_v53, %v418_v45  ;;  %v515_v28 = vshrl.u32 %v2360_v47, 16  ;;  %v518_v32 = vshll.u32 %v2360_v47, 16  ;;  %v430_v24 = vrot.slane %v428_v46, 5  ;;  %v2531_v45 = vld [vmem:[%s2249_s9 + $0x7c] sm:$0xf] }
  0x37   : > { %v427_v44 = vrot.slane %v425_v42, 4  ;;  %v551_v56 = vsel %vm348_vm1, %v461_v27, %v2483_v41  ;;  %v1843_v10 = vcombine.low %v2502_v8, %v2502_v8  ;;  %v2524_v34 = vcombine.low %v2253_v1, %v2320_v30  ;;  %v2534_v46 = vld [vmem:[%s2249_s9 + $0x80] sm:$0xf] }
  0x38   : > { %928 = vrot.lane.b32.xlu1 %v2396_v60, %s2158_s25  ;;  %v2536_v53 = vor.u32 %v413_v57, %v410_v52  ;;  %v508_v1 = vrot.slane %v3350_v26, 1  ;;  %v570_v30 = vld [vmem:[%s2249_s9 + $0x20] sm:$0x1]  ;;  %v517_v52 = vrot.slane %v515_v28, 4  ;;  %v520_v57 = vrot.slane %v518_v32, 5 }
  0x39   : > { %v2539_v63 = vor.u32 %v430_v24, %v427_v44  ;;  %v593_v44 = vshrl.u32 %v2402_v62, 16  ;;  %v2558_v26 = vld [vmem:[%s2249_s9 + $0x64] sm:$0xf]  ;;  %v1868_v28 = vld [vmem:[%s2249_s9 + $0x68] sm:$0x1]  ;;  %v2573_v32 = vcombine.low %v2531_v45, %v2534_v46  ;;  %v507_v18 = vor.u32 %v2377_v54, %v425_v42 }
  0x3a   : > { %955 = vrot.lane.b32.xlu0 %v2416_v14, %s2159_s26  ;;  %v2590_v54 = vsel %vm348_vm1, %v1843_v10, %v2536_v53  ;;  %v1854_v10 = vcombine.low %v2262_v4, %v2262_v4  ;;  %v3404_v4 = vshrl.u32 %v2365_v50, 16  ;;  %v2646_v47 = vld [vmem:[%s2249_s9 + $0x40] sm:$0xf] }
  0x3b   : > { %v2555_v24 = vsel %vm364_vm2, %v2511_v31, %v2539_v63  ;;  %v595_v27 = vrot.slane %v593_v44, 4  ;;  %3398 = vst [vmem:[#allocation20_spill] sm:$0xff] %v2590_v54 }
  0x3c   : > { %957 = vrot.lane.b32.xlu1 %v2431_v36, %s2159_s26 }
  0x3e   : > { %984 = vrot.lane.b32.xlu0 %v2447_v6, %s2160_s6  ;;  %v2600_v6 = vor.u32 %v520_v57, %v517_v52  ;;  %v2616_v52 = vsel %vm450_vm0, %v507_v18, %v508_v1 }
  0x40   : > { %783 = vrot.lane.b32.xlu1 %v2459_v49, %s2154_s11 }
  0x42   : > { %986 = vrot.lane.b32.xlu0 %v2474_v12, %s2160_s6 }
  0x44   : > { %785 = vrot.lane.b32.xlu1 %v444_v48, %s2154_s11  ;;  %v2528_v48 = vsel %vm348_vm1, %v1829_v43, %v1830_v51  ;;  %v2546_v43 = vcombine.low %v2330_v35, %v1810_v19  ;;  %v586_v51 = vrot.slane %v584_v22, 4  ;;  %v589_v35 = vrot.slane %v587_v0, 5  ;;  %v555_v0 = vld [vmem:[%s2249_s9 + $0x1c] sm:$0xf] }
  0x45   : > { %3395 = vst [vmem:[#allocation19_spill] sm:$0xff] %v2528_v48  ;;  %v3357_v19 = vshrl.u32 %v2524_v34, 16  ;;  %v2592_v42 = vcombine.low %v555_v0, %v570_v30  ;;  %v1853_v57 = vcombine.low %v555_v0, %v555_v0  ;;  %v3406_v0 = vshll.u32 %v2412_v13, 16 }
  0x46   : > { %813 = vrot.lane.b32.xlu0 %v460_v33, %s2156_s13  ;;  %v3353_v33 = vshll.u32 %v2524_v34, 16  ;;  %v2577_v23 = vor.u32 %v589_v35, %v586_v51  ;;  %v2595_v51 = vcombine.low %v2558_v26, %v1868_v28  ;;  %v3360_v35 = vshrl.u32 %v2546_v43, 16 }
  0x47   : > { %v2639_v55 = vrot.slane %v3406_v0, 5  ;;  %v605_v20 = vshll.u32 %v2592_v42, 16  ;;  %v1822_v0 = vcombine.low %v2256_v2, %v2256_v2  ;;  %v2681_v2 = vcombine.low %v2434_v37, %v2444_v7 }
  0x48   : > { %815 = vrot.lane.b32.xlu1 %v551_v56, %s2156_s13  ;;  %v2566_v56 = vrot.slane %v3353_v33, 1  ;;  %v3396_v33 = vshll.u32 %v2546_v43, 16  ;;  %v3364_v30 = vshll.u32 %v2595_v51, 16  ;;  %v3415_v37 = vshll.u32 %v2479_v5, 16 }
  0x49   : > { %3407 = vst [vmem:[#allocation24_spill] sm:$0xff] %v2639_v55 }
  0x4a   : > { %843 = vrot.lane.b32.xlu0 %v2342_v40, %s2153_s10  ;;  %v729_v22 = vor.u32 %v2566_v56, %v3357_v19  ;;  %v730_v16 = vrot.slane %v3396_v33, 1  ;;  %v3397_v40 = vshll.u32 %v2402_v62, 16  ;;  %v3399_v19 = vshrl.u32 %v2479_v5, 16 }
  0x4c   : > { %v598_v3 = vrot.slane %v3397_v40, 5  ;;  %845 = vrot.lane.b32.xlu1 %v2528_v48, %s2153_s10  ;;  %v510_v33 = vor.u32 %v508_v1, %v3399_v19  ;;  %v2603_v40 = vsel %vm450_vm0, %v729_v22, %v730_v16  ;;  %v732_v28 = vor.u32 %v730_v16, %v3360_v35  ;;  %v1845_v19 = vld [vmem:[%s2249_s9 + $0x40] sm:$0x1] }
  0x4d   : > { %3400 = vst [vmem:[#allocation21_spill] sm:$0xff] %v2603_v40  ;;  %v578_v16 = vrot.slane %v3404_v4, 4  ;;  %v3405_v35 = vshll.u32 %v2365_v50, 16  ;;  %v2635_v1 = vrot.slane %v3364_v30, 1  ;;  %v2650_v4 = vcombine.low %v2444_v7, %v1845_v19 }
  0x4e   : > { %v2605_v48 = vor.u32 %v598_v3, %v595_v27  ;;  %872 = vrot.lane.b32.xlu0 %v2573_v32, %s2155_s12  ;;  %v3402_v27 = vshrl.u32 %v2412_v13, 16  ;;  %v2666_v19 = vsel %vm348_vm1, %v1853_v57, %v1854_v10  ;;  %v3412_v30 = vshrl.u32 %v2304_v21, 16 }
  0x4f   : > { %v581_v18 = vrot.slane %v3405_v35, 5  ;;  %3409 = vst [vmem:[#allocation26_spill] sm:$0xff] %v2650_v4  ;;  %v2047_v35 = vld [vmem:[%s3338_s1 + $0x10] ss:$0 sps:$4 sm:$0x33]   ;;  %v2659_v13 = vsel %vm450_vm0, %v732_v28, %v2635_v1  ;;  %3411 = vst [vmem:[#allocation28_spill] sm:$0xff] %v2666_v19  ;;  %v1856_v28 = vcombine.low %v2646_v47, %v2646_v47  ;;  %v621_v10 = vor.u32 %v2453_v25, %v593_v44 }
  0x50   : > { %v2621_v3 = vsel %vm364_vm2, %v2577_v23, %v2605_v48  ;;  %v2625_v22 = vrot.slane %v3402_v27, 4  ;;  %874 = vrot.lane.b32.xlu1 %v2590_v54, %s2155_s12  ;;  %v2643_v27 = vsel %vm348_vm1, %v510_v33, %v2600_v6  ;;  %3410 = vst [vmem:[#allocation27_spill] sm:$0xff] %v2659_v13  ;;  %v376_v50 = vrot.slane %v3412_v30, 4  ;;  %1952 = vmatprep.subr.msk.bf16.mxu0 %vm1293_vm3, %v2047_v35 }
  0x51   : > { %3401 = vst [vmem:[#allocation22_spill] sm:$0xff] %v2621_v3  ;;  %3408 = vst [vmem:[#allocation25_spill] sm:$0xff] %v2643_v27  ;;  %v3413_v4 = vshll.u32 %v2304_v21, 16  ;;  %v2676_v13 = vor.u32 %v581_v18, %v578_v16  ;;  %v629_v33 = vshrl.u32 %v2416_v14, 16  ;;  %v622_v30 = vrot.slane %v605_v20, 1  ;;  %1953 = vmatprep.subr.msk.bf16.mxu1 %vm1293_vm3, %v2047_v35 }
  0x52   : > { %3403 = vst [vmem:[#allocation23_spill] sm:$0xff] %v2625_v22  ;;  %901 = vrot.lane.b32.xlu0 %v2616_v52, %s2157_s23  ;;  %v1295_v57 = vsel %vm1293_vm3, %v2047_v35, 0  ;;  %v1821_v16 = vcombine.low %v2389_v58, %v2389_v58  ;;  %v3414_v18 = vshrl.u32 %v2479_v5, 16  ;;  %v439_v25 = vrot.slane %v3415_v37, 5 }
  0x53   : > { %v379_v3 = vrot.slane %v3413_v4, 5  ;;  %v632_v4 = vshll.u32 %v2416_v14, 16  ;;  %1917 = vmatpush3.bf16.msra.mxu0 %v1295_v57  ;;  %v602_v35 = vshrl.u32 %v2592_v42, 16  ;;  %v1866_v14 = vcombine.low %v2337_v38, %v2337_v38  ;;  %1951 = vmatpush3.bf16.msra.mxu1 %v1295_v57 }
  0x54   : > { %903 = vrot.lane.b32.xlu1 %v2643_v27, %s2157_s23  ;;  %v436_v21 = vrot.slane %v3414_v18, 4  ;;  %v1865_v27 = vcombine.low %v2558_v26, %v2558_v26  ;;  %v2704_v58 = vsel %vm348_vm1, %v1856_v28, %v2676_v13  ;;  %v631_v5 = vrot.slane %v629_v33, 4  ;;  %v2721_v18 = vld [vmem:[%s2249_s9 + $0x88] sm:$0xf] }
  0x55   : > { %v2693_v44 = vor.u32 %v379_v3, %v376_v50  ;;  %3416 = vst [vmem:[#allocation29_spill] sm:$0xff] %v2704_v58  ;;  %v2707_v50 = vsel %vm348_vm1, %v1821_v16, %v1822_v0  ;;  %v2710_v42 = vsel %vm450_vm0, %v621_v10, %v622_v30  ;;  %v474_v26 = vshrl.u32 %v2292_v15, 16  ;;  %3420 = vst [vmem:[#allocation33_spill] sm:$0xff] %v2721_v18 }
  0x56   : > { %930 = vrot.lane.b32.xlu0 %v2402_v62, %s2158_s25  ;;  %3417 = vst [vmem:[#allocation30_spill] sm:$0xff] %v2707_v50  ;;  %v440_v3 = vor.u32 %v439_v25, %v436_v21  ;;  %v2714_v38 = vsel %vm348_vm1, %v1865_v27, %v1866_v14  ;;  %v2718_v57 = vcombine.low %v2444_v7, %v2646_v47  ;;  %v634_v33 = vrot.slane %v632_v4, 5 }
  0x57   : > { %3418 = vst [vmem:[#allocation31_spill] sm:$0xff] %v2714_v38  ;;  %v477_v21 = vshll.u32 %v2292_v15, 16  ;;  %v687_v14 = vshrl.u32 %v2298_v17, 16  ;;  %v381_v7 = vsel %vm364_vm2, %v2464_v61, %v2693_v44  ;;  %v690_v27 = vshll.u32 %v2298_v17, 16 }
  0x58   : > { %932 = vrot.lane.b32.xlu1 %v2666_v19, %s2158_s25  ;;  %3419 = vst [vmem:[#allocation32_spill] sm:$0xff] %v2718_v57  ;;  %v2728_v0 = vsel %vm364_vm2, %v2539_v63, %v440_v3  ;;  %v604_v28 = vrot.slane %v602_v35, 4  ;;  %v607_v10 = vrot.slane %v605_v20, 5  ;;  %v1869_v4 = vcombine.low %v2721_v18, %v2721_v18  ;;  %v1858_v57 = vld [vmem:[%s2249_s9 + $0x44] sm:$0x1] }
  0x59   : > { %3421 = vst [vmem:[#allocation34_spill] sm:$0xff] %v2728_v0  ;;  %v689_v16 = vrot.slane %v687_v14, 4  ;;  %v713_v63 = vshrl.u32 %v2595_v51, 16  ;;  %v740_v37 = vshrl.u32 %v2487_v39, 16  ;;  %v692_v25 = vrot.slane %v690_v27, 5 }
  0x5a   : > { %959 = vrot.lane.b32.xlu0 %v2681_v2, %s2159_s26  ;;  %v608_v3 = vor.u32 %v607_v10, %v604_v28  ;;  %v743_v50 = vshll.u32 %v2487_v39, 16  ;;  %v3422_v61 = vshrl.u32 %v2524_v34, 16  ;;  %v3423_v20 = vshrl.u32 %v2317_v29, 16 }
  0x5b   : > { %v3424_v18 = vshll.u32 %v2317_v29, 16  ;;  %v742_v19 = vrot.slane %v740_v37, 4  ;;  %v3425_v22 = vshll.u32 %v2524_v34, 16  ;;  %v693_v28 = vor.u32 %v692_v25, %v689_v16 }
  0x5c   : > { %795 = vrot.lane.b32.xlu1 %v2285_v11, %s2154_s11  ;;  %v697_v17 = vrot.slane %v3422_v61, 4  ;;  %v385_v38 = vrot.slane %v3423_v20, 4  ;;  %v2755_v10 = vsel %vm364_vm2, %v2605_v48, %v608_v3  ;;  %v735_v61 = vor.u32 %v2635_v1, %v713_v63 }
  0x5d   : > { %v388_v0 = vrot.slane %v3424_v18, 5  ;;  %v700_v55 = vrot.slane %v3425_v22, 5  ;;  %v745_v54 = vrot.slane %v743_v50, 5  ;;  %v476_v20 = vrot.slane %v474_v26, 4 }
  0x5e   : > { %961 = vrot.lane.b32.xlu0 %v2704_v58, %s2159_s26  ;;  %v624_v58 = vor.u32 %v622_v30, %v602_v35  ;;  %v2761_v18 = vcombine.low %v2646_v47, %v1858_v57  ;;  %v2763_v37 = vor.u32 %v634_v33, %v631_v5  ;;  %v479_v22 = vrot.slane %v477_v21, 5 }
  0x5f   : > { %v701_v40 = vor.u32 %v700_v55, %v697_v17  ;;  %v2766_v16 = vsel %vm348_vm1, %v1869_v4, %v693_v28  ;;  %v2768_v48 = vor.u32 %v745_v54, %v742_v19  ;;  %v483_v1 = vshrl.u32 %v2459_v49, 16 }
  0x60   : > { %988 = vrot.lane.b32.xlu1 %v2710_v42, %s2160_s6  ;;  %v2775_v30 = vor.u32 %v388_v0, %v385_v38  ;;  %v486_v17 = vshll.u32 %v2459_v49, 16  ;;  %v725_v55 = vrot.slane %v690_v27, 1  ;;  %v2786_v54 = vsel %vm348_vm1, %v624_v58, %v2763_v37 }
  0x61   : > { %v2773_v50 = vsel %vm364_vm2, %v693_v28, %v701_v40  ;;  %v2780_v47 = vsel %vm348_vm1, %v735_v61, %v2768_v48  ;;  %v480_v19 = vor.u32 %v479_v22, %v476_v20  ;;  %v485_v26 = vrot.slane %v483_v1, 4 }
  0x62   : > { %787 = vrot.lane.b32.xlu0 %v381_v7, %s2154_s11  ;;  %v726_v35 = vor.u32 %v725_v55, %v687_v14  ;;  %v390_v5 = vsel %vm364_vm2, %v2693_v44, %v2775_v30  ;;  %v488_v38 = vrot.slane %v486_v17, 5  ;;  %v3426_v44 = vshrl.u32 %v2546_v43, 16 }
  0x63   : > { %v481_v58 = vsel %vm364_vm2, %v2483_v41, %v480_v19  ;;  %v523_v41 = vshrl.u32 %v2285_v11, 16  ;;  %v715_v14 = vrot.slane %v713_v63, 4  ;;  %v3428_v7 = vshll.u32 %v2595_v51, 16 }
  0x64   : > { %797 = vrot.lane.b32.xlu1 %v2573_v32, %s2154_s11  ;;  %v2795_v57 = vsel %vm450_vm0, %v726_v35, %v2566_v56  ;;  %v2802_v33 = vor.u32 %v488_v38, %v485_v26  ;;  %v526_v56 = vshll.u32 %v2285_v11, 16  ;;  %v706_v21 = vrot.slane %v3426_v44, 4  ;;  %v3430_v26 = vld [vmem:[#allocation20_spill] sm:$0xff]  ;;  %v3432_v44 = vld [vmem:[#allocation26_spill] sm:$0xff] }
  0x65   : > { %v718_v27 = vrot.slane %v3428_v7, 5  ;;  %v525_v4 = vrot.slane %v523_v41, 4  ;;  %v532_v3 = vshrl.u32 %v2573_v32, 16  ;;  %v535_v63 = vshll.u32 %v2573_v32, 16  ;;  %v3434_v7 = vld [vmem:[#allocation23_spill] sm:$0xff] }
  0x66   : > { %825 = vrot.lane.b32.xlu0 %v2394_v59, %s2156_s13  ;;  %v490_v59 = vsel %vm364_vm2, %v480_v19, %v2802_v33 }
  0x67   : > { %v719_v25 = vor.u32 %v718_v27, %v715_v14  ;;  %v537_v61 = vrot.slane %v535_v63, 5  ;;  %v3433_v14 = vld [vmem:[#allocation24_spill] sm:$0xff] }
  0x68   : > { %990 = vrot.lane.b32.xlu1 %v2786_v54, %s2160_s6  ;;  %v3435_v27 = vor.u32 %v3433_v14, %v3434_v7  ;;  %v3441_v14 = vld [vmem:[#allocation28_spill] sm:$0xff] }
  0x6a   : > { %789 = vrot.lane.b32.xlu0 %v390_v5, %s2154_s11  ;;  %v646_v5 = vshrl.u32 %v2681_v2, 16 }
  0x6c   : > { %817 = vrot.lane.b32.xlu1 %v481_v58, %s2156_s13  ;;  %v3431_v58 = vld [vmem:[#allocation22_spill] sm:$0xff]  ;;  %v648_v41 = vrot.slane %v646_v5, 4 }
  0x6e   : > { %827 = vrot.lane.b32.xlu0 %v2616_v52, %s2156_s13  ;;  %v2820_v52 = vcombine.low %v2278_v9, %v2531_v45  ;;  %v528_v9 = vrot.slane %v526_v56, 5 }
  0x70   : > { %855 = vrot.lane.b32.xlu1 %v2396_v60, %s2153_s10  ;;  %v3427_v60 = vshll.u32 %v2546_v43, 16 }
  0x72   : > { %819 = vrot.lane.b32.xlu0 %v490_v59, %s2156_s13  ;;  %v709_v0 = vrot.slane %v3427_v60, 5  ;;  %v495_v60 = vshll.u32 %v3432_v44, 16 }
  0x74   : > { %847 = vrot.lane.b32.xlu1 %v2487_v39, %s2153_s10  ;;  %v710_v45 = vor.u32 %v709_v0, %v706_v21  ;;  %v492_v21 = vshrl.u32 %v3432_v44, 16 }
  0x76   : > { %857 = vrot.lane.b32.xlu0 %v2402_v62, %s2153_s10  ;;  %v423_v62 = vsel %vm364_vm2, %v2536_v53, %v2511_v31  ;;  %v2838_v51 = vsel %vm364_vm2, %v710_v45, %v719_v25  ;;  %v2841_v28 = vsel %vm364_vm2, %v701_v40, %v710_v45  ;;  %v529_v31 = vor.u32 %v528_v9, %v525_v4  ;;  %v3436_v4 = vld [vmem:[#allocation27_spill] sm:$0xff] }
  0x77   : > { %v534_v53 = vrot.slane %v532_v3, 4  ;;  %v494_v25 = vrot.slane %v492_v21, 4  ;;  %v497_v3 = vrot.slane %v495_v60, 5  ;;  %v1846_v60 = vld [vmem:[%s2249_s9 + $0x88] sm:$0x1] }
  0x78   : > { %884 = vrot.lane.b32.xlu1 %v2431_v36, %s2155_s12  ;;  %v2850_v20 = vsel %vm364_vm2, %v2600_v6, %v529_v31  ;;  %v637_v6 = vshrl.u32 %v2431_v36, 16 }
  0x79   : > { %v2854_v40 = vor.u32 %v537_v61, %v534_v53 }
  0x7a   : > { %849 = vrot.lane.b32.xlu0 %v2820_v52, %s2153_s10  ;;  %v639_v1 = vrot.slane %v637_v6, 4  ;;  %v3437_v6 = vld [vmem:[#allocation25_spill] sm:$0xff] }
  0x7b   : > { %v2862_v22 = vsel %vm364_vm2, %v529_v31, %v2854_v40 }
  0x7c   : > { %876 = vrot.lane.b32.xlu1 %v423_v62, %s2155_s12 }
  0x7e   : > { %886 = vrot.lane.b32.xlu0 %v2681_v2, %s2155_s12 }
  0x80   : > { %913 = vrot.lane.b32.xlu1 %v2474_v12, %s2157_s23  ;;  %v640_v12 = vshll.u32 %v2431_v36, 16 }
  0x82   : > { %878 = vrot.lane.b32.xlu0 %v2555_v24, %s2155_s12  ;;  %v642_v17 = vrot.slane %v640_v12, 5  ;;  %v3438_v12 = vld [vmem:[#allocation11_spill] sm:$0xff] }
  0x84   : > { %905 = vrot.lane.b32.xlu1 %v2850_v20, %s2157_s23  ;;  %v643_v19 = vor.u32 %v642_v17, %v639_v1  ;;  %v3439_v17 = vld [vmem:[#allocation12_spill] sm:$0xff] }
  0x86   : > { %915 = vrot.lane.b32.xlu0 %v2710_v42, %s2157_s23  ;;  %v2885_v42 = vcombine.low %v2534_v46, %v2502_v8  ;;  %v649_v46 = vshll.u32 %v2681_v2, 16  ;;  %v2899_v38 = vsel %vm364_vm2, %v2763_v37, %v643_v19  ;;  %v399_v37 = vsel %vm364_vm2, %v2775_v30, %v3435_v27 }
  0x87   : > { %v498_v30 = vor.u32 %v497_v3, %v494_v25 }
  0x88   : > { %942 = vrot.lane.b32.xlu1 %v2524_v34, %s2158_s25  ;;  %v2879_v34 = vsel %vm364_vm2, %v2676_v13, %v2577_v23  ;;  %v3429_v23 = vld [vmem:[#allocation21_spill] sm:$0xff]  ;;  %v651_v56 = vrot.slane %v649_v46, 5 }
  0x89   : > { %v499_v46 = vsel %vm364_vm2, %v2802_v33, %v498_v30 }
  0x8a   : > { %907 = vrot.lane.b32.xlu0 %v2862_v22, %s2157_s23  ;;  %v2914_v45 = vor.u32 %v651_v56, %v648_v41 }
  0x8c   : > { %934 = vrot.lane.b32.xlu1 %v2292_v15, %s2158_s25  ;;  %v2920_v53 = vsel %vm364_vm2, %v643_v19, %v2914_v45 }
  0x8e   : > { %944 = vrot.lane.b32.xlu0 %v2546_v43, %s2158_s25 }
  0x90   : > { %971 = vrot.lane.b32.xlu1 %v2820_v52, %s2159_s26 }
  0x92   : > { %936 = vrot.lane.b32.xlu0 %v2459_v49, %s2158_s25 }
  0x93   : > { %v842_v43 = vpop.permute.xlu1 %841 }
  0x94   : > { %963 = vrot.lane.b32.xlu1 %v2879_v34, %s2159_s26  ;;  %v780_v55 = vpop.permute.xlu0 %779 }
  0x95   : > { %v1014_v1 = vsel %vm1012_vm4, %v3438_v12, %v780_v55  ;;  %v3440_v55 = vld [vmem:[#allocation14_spill] sm:$0xff] }
  0x96   : > { %973 = vrot.lane.b32.xlu0 %v2885_v42, %s2159_s26 }
  0x97   : > { %v871_v13 = vpop.permute.xlu1 %870 }
  0x98   : > { %1000 = vrot.lane.b32.xlu1 %v3429_v23, %s2160_s6  ;;  %v782_v35 = vpop.permute.xlu0 %781 }
  0x99   : > { %v1016_v23 = vsel %vm1012_vm4, %v3439_v17, %v782_v35 }
  0x9a   : > { %799 = vrot.lane.b32.xlu0 %v3430_v26, %s2154_s11 }
  0x9c   : > { %965 = vrot.lane.b32.xlu1 %v3431_v58, %s2159_s26  ;;  %v840_v59 = vpop.permute.xlu0 %839 }
  0x9e   : > { %v810_v0 = vpop.permute.xlu1 %809  ;;  %992 = vrot.lane.b32.xlu0 %v2899_v38, %s2160_s6 }
  0x9f   : > { %v1043_v5 = vsel %vm1041_vm5, %v1014_v1, %v810_v0 }
  0xa0   : > { %1002 = vrot.lane.b32.xlu1 %v3436_v4, %s2160_s6  ;;  %v869_v9 = vpop.permute.xlu0 %868  ;;  %v1072_v35 = vsel %vm1070_vm6, %v1043_v5, %v840_v59  ;;  %v3445_v5 = vld [vmem:[#allocation34_spill] sm:$0xff] }
  0xa1   : > { %v1101_v44 = vsel %vm1099_vm7, %v1072_v35, %v869_v9 }
  0xa2   : > { %v812_v63 = vpop.permute.xlu1 %811  ;;  %791 = vrot.lane.b32.xlu0 %v399_v37, %s2154_s11  ;;  %v1848_v37 = vcombine.low %v2502_v8, %v1846_v60  ;;  %v3449_v60 = vld [vmem:[#allocation32_spill] sm:$0xff] }
  0xa3   : > { %v1045_v19 = vsel %vm1041_vm5, %v1016_v23, %v812_v63 }
  0xa4   : > { %801 = vrot.lane.b32.xlu1 %v423_v62, %s2154_s11  ;;  %v898_v31 = vpop.permute.xlu0 %897  ;;  %v1074_v41 = vsel %vm1070_vm6, %v1045_v19, %v842_v43  ;;  %v544_v30 = vshll.u32 %v1848_v37, 16 }
  0xa5   : > { %v1130_v33 = vsel %vm1128_vm8, %v1101_v44, %v898_v31  ;;  %v1103_v0 = vsel %vm1099_vm7, %v1074_v41, %v871_v13  ;;  %v3442_v13 = vld [vmem:[#allocation16_spill] sm:$0xff]  ;;  %v541_v31 = vshrl.u32 %v1848_v37, 16  ;;  %v3446_v41 = vld [vmem:[#allocation17_spill] sm:$0xff] }
  0xa6   : > { %v900_v61 = vpop.permute.xlu1 %899  ;;  %829 = vrot.lane.b32.xlu0 %v3437_v6, %s2156_s13  ;;  %v546_v17 = vrot.slane %v544_v30, 5 }
  0xa7   : > { %v1132_v4 = vsel %vm1128_vm8, %v1103_v0, %v900_v61  ;;  %v3443_v61 = vld [vmem:[#allocation29_spill] sm:$0xff]  ;;  %v543_v1 = vrot.slane %v541_v31, 4  ;;  %v3451_v31 = vld [vmem:[#allocation30_spill] sm:$0xff] }
  0xa8   : > { %994 = vrot.lane.b32.xlu1 %v2920_v53, %s2160_s6  ;;  %v927_v62 = vpop.permute.xlu0 %926 }
  0xa9   : > { %v1159_v59 = vsel %vm1157_vm9, %v1130_v33, %v927_v62  ;;  %v3444_v62 = vld [vmem:[#allocation15_spill] sm:$0xff] }
  0xaa   : > { %v929_v26 = vpop.permute.xlu1 %928  ;;  %793 = vrot.lane.b32.xlu0 %v3440_v55, %s2154_s11 }
  0xab   : > { %v1161_v9 = vsel %vm1157_vm9, %v1132_v4, %v929_v26 }
  0xac   : > { %821 = vrot.lane.b32.xlu1 %v499_v46, %s2156_s13  ;;  %v956_v56 = vpop.permute.xlu0 %955  ;;  %v547_v46 = vor.u32 %v546_v17, %v543_v1 }
  0xad   : > { %v1188_v43 = vsel %vm1186_vm10, %v1159_v59, %v956_v56 }
  0xae   : > { %v958_v21 = vpop.permute.xlu1 %957  ;;  %831 = vrot.lane.b32.xlu0 %v2850_v20, %s2156_s13  ;;  %v2975_v55 = vsel %vm364_vm2, %v2854_v40, %v547_v46  ;;  %v3448_v40 = vld [vmem:[#allocation18_spill] sm:$0xff] }
  0xaf   : > { %v1190_v25 = vsel %vm1186_vm10, %v1161_v9, %v958_v21 }
  0xb0   : > { %859 = vrot.lane.b32.xlu1 %v3441_v14, %s2153_s10  ;;  %v985_v7 = vpop.permute.xlu0 %984 }
  0xb1   : > { %v1217_v27 = vsel %vm1215_vm11, %v1188_v43, %v985_v7  ;;  %v655_v7 = vshrl.u32 %v2761_v18, 16 }
  0xb2   : > { %v784_v20 = vpop.permute.xlu1 %783  ;;  %1918 = vmatprep.mubr.msk.bf16.mxu0 %vm1264_vm12, %v1217_v27  ;;  %823 = vrot.lane.b32.xlu0 %v3442_v13, %s2156_s13  ;;  %v658_v27 = vshll.u32 %v2761_v18, 16  ;;  %v751_v13 = vshll.u32 %v2820_v52, 16 }
  0xb3   : > { %v1018_v21 = vsel %vm1012_vm4, %v2317_v29, %v784_v20  ;;  %v748_v20 = vshrl.u32 %v2820_v52, 16 }
  0xb4   : > { %851 = vrot.lane.b32.xlu1 %v2885_v42, %s2153_s10  ;;  %v987_v3 = vpop.permute.xlu0 %986  ;;  %v753_v1 = vrot.slane %v751_v13, 5 }
  0xb5   : > { %v1219_v63 = vsel %vm1215_vm11, %v1190_v25, %v987_v3  ;;  %v3450_v25 = vld [vmem:[#allocation10_spill] sm:$0xff]  ;;  %v657_v3 = vrot.slane %v655_v7, 4 }
  0xb6   : > { %v786_v6 = vpop.permute.xlu1 %785  ;;  %1919 = vmatmul.mubr.msk.bf16.vlgmr.msra.gmra.mrb[0].mxu0 %vm1264_vm12, %v1219_v63  ;;  %861 = vrot.lane.b32.xlu0 %v2292_v15, %s2153_s10  ;;  %v660_v63 = vrot.slane %v658_v27, 5 }
  0xb8   : > { %888 = vrot.lane.b32.xlu1 %v3443_v61, %s2155_s12  ;;  %v814_v12 = vpop.permute.xlu0 %813 }
  0xb9   : > { %v1047_v59 = vsel %vm1041_vm5, %v1018_v21, %v814_v12  ;;  %v750_v12 = vrot.slane %v748_v20, 4  ;;  %v1871_v21 = vld [vmem:[%s2249_s9 + $0x8c] sm:$0x1]  ;;  %s1955_s9 = smul.u32 56, %s2243_s30  ;;  %s3251_s30 = sand.u32 1, %s2143_s19  }
  0xba   : > { %v816_v23 = vpop.permute.xlu1 %815  ;;  %853 = vrot.lane.b32.xlu0 %v3444_v62, %s2153_s10  ;;  %s227_s16 = scalar_lea.vmem [#allocation2], %s3251_s30 }
  0xbb   : > { %s3212_s14 = scalar_lea.vmem %s3340_s3, %s1955_s9  ;;  %s1670_s17 = sshll.u32 %s227_s16, 4  ;;  %s3263_s17 = int_to_ptr.vmem [resolvable:$true] %s1670_s17 }
  0xbc   : > { %880 = vrot.lane.b32.xlu1 %v3445_v5, %s2155_s12  ;;  %v844_v19 = vpop.permute.xlu0 %843  ;;  %s3269_s9 = scalar_lea.hbm %s3342_s5, %s1891_s15 }
  0xbd   : > { %v1076_v43 = vsel %vm1070_vm6, %v1047_v59, %v844_v19  ;;  %v661_v19 = vor.u32 %v660_v63, %v657_v3 }
  0xbe   : > { %v846_v26 = vpop.permute.xlu1 %845  ;;  %890 = vrot.lane.b32.xlu0 %v2879_v34, %s2155_s12  ;;  %v3447_v34 = vld [vmem:[#allocation31_spill] sm:$0xff] }
  0xc0   : > { %917 = vrot.lane.b32.xlu1 %v2786_v54, %s2157_s23  ;;  %v873_v15 = vpop.permute.xlu0 %872 }
  0xc1   : > { %v1105_v14 = vsel %vm1099_vm7, %v1076_v43, %v873_v15 }
  0xc2   : > { %v875_v35 = vpop.permute.xlu1 %874  ;;  %882 = vrot.lane.b32.xlu0 %v3446_v41, %s2155_s12 }
  0xc4   : > { %909 = vrot.lane.b32.xlu1 %v2975_v55, %s2157_s23  ;;  %v902_v56 = vpop.permute.xlu0 %901 }
  0xc5   : > { %v1134_v29 = vsel %vm1128_vm8, %v1105_v14, %v902_v56  ;;  %v754_v56 = vor.u32 %v753_v1, %v750_v12 }
  0xc6   : > { %v904_v44 = vpop.permute.xlu1 %903  ;;  %919 = vrot.lane.b32.xlu0 %v2899_v38, %s2157_s23 }
  0xc8   : > { %946 = vrot.lane.b32.xlu1 %v3447_v34, %s2158_s25  ;;  %v931_v54 = vpop.permute.xlu0 %930 }
  0xc9   : > { %v1163_v4 = vsel %vm1157_vm9, %v1134_v29, %v931_v54 }
  0xca   : > { %v933_v33 = vpop.permute.xlu1 %932  ;;  %911 = vrot.lane.b32.xlu0 %v3448_v40, %s2157_s23 }
  0xcc   : > { %938 = vrot.lane.b32.xlu1 %v3449_v60, %s2158_s25  ;;  %v960_v0 = vpop.permute.xlu0 %959 }
  0xce   : > { %v2993_v38 = vpop.permute.xlu1 %795  ;;  %948 = vrot.lane.b32.xlu0 %v2285_v11, %s2158_s25  ;;  %v1192_v11 = vsel %vm1186_vm10, %v1163_v4, %v960_v0 }
  0xd0   : > { %975 = vrot.lane.b32.xlu1 %v2766_v16, %s2159_s26  ;;  %v962_v37 = vpop.permute.xlu0 %961  ;;  %v1020_v16 = vsel %vm1012_vm4, %v3451_v31, %v786_v6  ;;  %v3453_v31 = vld [vmem:[#allocation8_spill] sm:$0xff] }
  0xd1   : > { %v1049_v61 = vsel %vm1041_vm5, %v1020_v16, %v816_v23  ;;  %v1030_v16 = vsel %vm1012_vm4, %v3453_v31, %v2993_v38 }
  0xd2   : > { %v989_v9 = vpop.permute.xlu1 %988  ;;  %940 = vrot.lane.b32.xlu0 %v3450_v25, %s2158_s25  ;;  %v1078_v17 = vsel %vm1070_vm6, %v1049_v61, %v846_v26 }
  0xd3   : > { %v1221_v18 = vsel %vm1215_vm11, %v1192_v11, %v989_v9  ;;  %v1107_v6 = vsel %vm1099_vm7, %v1078_v17, %v875_v35  ;;  %v662_v35 = vsel %vm364_vm2, %v2914_v45, %v661_v19 }
  0xd4   : > { %967 = vrot.lane.b32.xlu1 %v2755_v10, %s2159_s26  ;;  %1922 = vmatprep.mubr.msk.bf16.mxu0 %vm1264_vm12, %v1221_v18  ;;  %v3015_v30 = vpop.permute.xlu0 %787  ;;  %v1136_v46 = vsel %vm1128_vm8, %v1107_v6, %v904_v44  ;;  %v755_v44 = vsel %vm364_vm2, %v2768_v48, %v754_v56 }
  0xd5   : > { %v1165_v23 = vsel %vm1157_vm9, %v1136_v46, %v933_v33  ;;  %v1022_v46 = vsel %vm1012_vm4, %v3446_v41, %v3015_v30 }
  0xd6   : > { %v3019_v62 = vpop.permute.xlu1 %797  ;;  %977 = vrot.lane.b32.xlu0 %v2773_v50, %s2159_s26  ;;  %v1194_v26 = vsel %vm1186_vm10, %v1165_v23, %v962_v37 }
  0xd8   : > { %1004 = vrot.lane.b32.xlu1 %v2780_v47, %s2160_s6  ;;  %v3027_v15 = vpop.permute.xlu0 %825 }
  0xd9   : > { %v1059_v61 = vsel %vm1041_vm5, %v1030_v16, %v3027_v15 }
  0xda   : > { %v991_v34 = vpop.permute.xlu1 %990  ;;  %803 = vrot.lane.b32.xlu0 %v2555_v24, %s2154_s11 }
  0xdb   : > { %v1223_v50 = vsel %vm1215_vm11, %v1194_v26, %v991_v34  ;;  %v3454_v26 = vld [vmem:[#allocation13_spill] sm:$0xff] }
  0xdc   : > { %969 = vrot.lane.b32.xlu1 %v2487_v39, %s2159_s26  ;;  %1923 = vmatmul.mubr.msk.bf16.gmra.mrb[4].mxu0 %vm1264_vm12, %v1223_v50  ;;  %v3039_v47 = vpop.permute.xlu0 %789  ;;  %v1032_v34 = vsel %vm1012_vm4, %v3454_v26, %v3019_v62 }
  0xde   : > { %v3043_v54 = vpop.permute.xlu1 %817  ;;  %996 = vrot.lane.b32.xlu0 %v662_v35, %s2160_s6 }
  0xdf   : > { %v1051_v15 = vsel %vm1041_vm5, %v1022_v46, %v3043_v54 }
  0xe0   : > { %1006 = vrot.lane.b32.xlu1 %v755_v44, %s2160_s6  ;;  %v3047_v24 = vpop.permute.xlu0 %827 }
  0xe1   : > { %v1061_v41 = vsel %vm1041_vm5, %v1032_v34, %v3047_v24 }
  0xe2   : > { %v856_v45 = vpop.permute.xlu1 %855  ;;  %805 = vrot.lane.b32.xlu0 %v3445_v5, %s2154_s11  ;;  %s2057_s11 = scalar_lea.vmem %s3263_s17, 16 }
  0xe3   : > { %p2058_p11 = scmp.ne.s32.totalorder %s3263_s17, %s2057_s11 }
  0xe4   : > { %833 = vrot.lane.b32.xlu1 %v2862_v22, %s2156_s13  ;;  %v3053_v33 = vpop.permute.xlu0 %819  ;;  %v3452_v22 = vld [vmem:[#allocation33_spill] sm:$0xff] }
  0xe5   : > { %v1872_v59 = vcombine.low %v3452_v22, %v1871_v21  ;;  %p2059_p12 = pnand %p2058_p11, %p2231_p5 }
  0xe6   : > { %v848_v40 = vpop.permute.xlu1 %847  ;;  %998 = vrot.lane.b32.xlu0 %v2795_v57, %s2160_s6  ;;  %v757_v57 = vshrl.u32 %v2885_v42, 16 }
  0xe7   : > { %v769_v7 = vshll.u32 %v1872_v59, 16  ;;  %v1080_v50 = vsel %vm1070_vm6, %v1051_v15, %v848_v40  ;;  %p2060_p13 = pneg %p2059_p12 }
  0xe8   : > { %835 = vrot.lane.b32.xlu1 %v2975_v55, %s2156_s13  ;;  %v858_v48 = vpop.permute.xlu0 %857  ;;  %v760_v55 = vshll.u32 %v2885_v42, 16 }
  0xe9   : > { %v771_v20 = vrot.slane %v769_v7, 5  ;;  %v1090_v44 = vsel %vm1070_vm6, %v1061_v41, %v858_v48 }
  0xea   : > { %v885_v0 = vpop.permute.xlu1 %884  ;;  %863 = vrot.lane.b32.xlu0 %v2459_v49, %s2153_s10  ;;  %v766_v49 = vshrl.u32 %v1872_v59, 16  ;;  %v762_v29 = vrot.slane %v760_v55, 5  ;;  %v1024_v55 = vsel %vm1012_vm4, %v2431_v36, %v3039_v47 }
  0xec   : > { %865 = vrot.lane.b32.xlu1 %v3449_v60, %s2153_s10  ;;  %v3064_v5 = vpop.permute.xlu0 %849  ;;  %v759_v60 = vrot.slane %v757_v57, 4  ;;  %v768_v4 = vrot.slane %v766_v49, 4  ;;  %v1053_v49 = vsel %vm1041_vm5, %v1024_v55, %v3053_v33  ;;  %v3456_v55 = vld [vmem:[#allocation9_spill] sm:$0xff]  ;;  %s1651_s10 = scalar_lea.sflag [#allocation3], %s3251_s30 }
  0xed   : > { %v1082_v7 = vsel %vm1070_vm6, %v1053_v49, %v3064_v5 }
  0xee   : > { %v877_v43 = vpop.permute.xlu1 %876  ;;  %892 = vrot.lane.b32.xlu0 %v3431_v58, %s2155_s12  ;;  %v1867_v58 = vcombine.low %v2502_v8, %v3452_v22  ;;  %v772_v9 = vor.u32 %v771_v20, %v768_v4 }
  0xef   : > { %v1109_v30 = vsel %vm1099_vm7, %v1080_v50, %v877_v43 }
  0xf0   : > { %894 = vrot.lane.b32.xlu1 %v2755_v10, %s2155_s12  ;;  %v887_v14 = vpop.permute.xlu0 %886  ;;  %v763_v10 = vor.u32 %v762_v29, %v759_v60  ;;  %s2161_s12 = smov [#allocation2]  }
  0xf1   : > { %v1119_v21 = vsel %vm1099_vm7, %v1090_v44, %v887_v14  ;;  %s2061_s13 = sshll.u32 %s2161_s12, 4  ;;  %s2062_s13 = int_to_ptr.vmem [resolvable:$false] %s2061_s13 }
  0xf2   : > { %v914_v27 = vpop.permute.xlu1 %913  ;;  %921 = vrot.lane.b32.xlu0 %v2920_v53, %s2157_s23  ;;  %v764_v25 = vsel %vm364_vm2, %v754_v56, %v763_v10  ;;  %v773_v18 = vsel %vm364_vm2, %v763_v10, %v772_v9  ;;  %p2064_p0 = scmp.lt.s32.totalorder %s3263_s17, %s2062_s13 }
  0xf4   : > { %923 = vrot.lane.b32.xlu1 %v662_v35, %s2157_s23  ;;  %v879_v37 = vpop.permute.xlu0 %878  ;;  %s233_s23 = scalar_lea.vmem [#allocation4], %s3251_s30 }
  0xf5   : > { %v1111_v60 = vsel %vm1099_vm7, %v1082_v7, %v879_v37 }
  0xf6   : > { %v906_v13 = vpop.permute.xlu1 %905  ;;  %950 = vrot.lane.b32.xlu0 %v2573_v32, %s2158_s25 }
  0xf7   : > { %v1138_v54 = vsel %vm1128_vm8, %v1109_v30, %v906_v13 }
  0xf8   : > { %952 = vrot.lane.b32.xlu1 %v1867_v58, %s2158_s25  ;;  %v916_v11 = vpop.permute.xlu0 %915  ;;  %s1683_s25 = sshll.u32 %s233_s23, 4  ;;  %s3271_s25 = int_to_ptr.vmem [resolvable:$true] %s1683_s25 }
  0xf9   : > { %v1148_v62 = vsel %vm1128_vm8, %v1119_v21, %v916_v11 }
  0xfa   : > { %v943_v53 = vpop.permute.xlu1 %942  ;;  %979 = vrot.lane.b32.xlu0 %v2841_v28, %s2159_s26 }
  0xfc   : > { %981 = vrot.lane.b32.xlu1 %v2838_v51, %s2159_s26  ;;  %v908_v8 = vpop.permute.xlu0 %907  ;;  %v1088_v51 = vsel %vm1070_vm6, %v1059_v61, %v856_v45 }
  0xfd   : > { %v1117_v1 = vsel %vm1099_vm7, %v1088_v51, %v885_v0  ;;  %v1140_v29 = vsel %vm1128_vm8, %v1111_v60, %v908_v8 }
  0xfe   : > { %v935_v3 = vpop.permute.xlu1 %934  ;;  %1008 = vrot.lane.b32.xlu0 %v764_v25, %s2160_s6  ;;  %v1146_v17 = vsel %vm1128_vm8, %v1117_v1, %v914_v27  ;;  %v3455_v1 = vld [vmem:[#allocation19_spill] sm:$0xff] }
  0xff   : > { %v1175_v19 = vsel %vm1157_vm9, %v1146_v17, %v943_v53  ;;  %v1167_v0 = vsel %vm1157_vm9, %v1138_v54, %v935_v3 }
 0x100   : > { %1010 = vrot.lane.b32.xlu1 %v773_v18, %s2160_s6  ;;  %v945_v32 = vpop.permute.xlu0 %944 }
 0x101   : > { %v1177_v59 = vsel %vm1157_vm9, %v1148_v62, %v945_v32 }
 0x102   : > { %v972_v63 = vpop.permute.xlu1 %971 }
 0x103   : > { %v1204_v38 = vsel %vm1186_vm10, %v1175_v19, %v972_v63 }
 0x104   : > { %v937_v28 = vpop.permute.xlu0 %936 }
 0x105   : > { %v1169_v4 = vsel %vm1157_vm9, %v1140_v29, %v937_v28 }
 0x106   : > { %v964_v12 = vpop.permute.xlu1 %963 }
 0x107   : > { %v1196_v40 = vsel %vm1186_vm10, %v1167_v0, %v964_v12 }
 0x108   : > { %v974_v6 = vpop.permute.xlu0 %973 }
 0x109   : > { %v1206_v43 = vsel %vm1186_vm10, %v1177_v59, %v974_v6 }
 0x10a   : > { %v1001_v23 = vpop.permute.xlu1 %1000 }
 0x10b   : > { %v1233_v56 = vsel %vm1215_vm11, %v1204_v38, %v1001_v23 }
 0x10c   : > { %1934 = vmatprep.mubr.msk.bf16.mxu1 %vm1264_vm12, %v1233_v56  ;;  %v800_v35 = vpop.permute.xlu0 %799 }
 0x10d   : > { %v1034_v17 = vsel %vm1012_vm4, %v3455_v1, %v800_v35 }
 0x10e   : > { %v966_v45 = vpop.permute.xlu1 %965 }
 0x10f   : > { %v1198_v20 = vsel %vm1186_vm10, %v1169_v4, %v966_v45 }
 0x110   : > { %v993_v22 = vpop.permute.xlu0 %992 }
 0x111   : > { %v1225_v24 = vsel %vm1215_vm11, %v1196_v40, %v993_v22 }
 0x112   : > { %v1003_v57 = vpop.permute.xlu1 %1002  ;;  %1926 = vmatprep.mubr.msk.bf16.mxu0 %vm1264_vm12, %v1225_v24 }
 0x113   : > { %v1235_v48 = vsel %vm1215_vm11, %v1206_v43, %v1003_v57 }
 0x114   : > { %1935 = vmatmul.mubr.msk.bf16.vlgmr.msra.gmra.mrb[0].mxu1 %vm1264_vm12, %v1235_v48  ;;  %v792_v14 = vpop.permute.xlu0 %791 }
 0x115   : > { %v1026_v34 = vsel %vm1012_vm4, %v2681_v2, %v792_v14 }
 0x116   : > { %v802_v27 = vpop.permute.xlu1 %801 }
 0x117   : > { %v1036_v44 = vsel %vm1012_vm4, %v2487_v39, %v802_v27 }
 0x118   : > { %v830_v58 = vpop.permute.xlu0 %829 }
 0x119   : > { %v1063_v19 = vsel %vm1041_vm5, %v1034_v17, %v830_v58 }
 0x11a   : > { %v995_v36 = vpop.permute.xlu1 %994 }
 0x11b   : > { %v1227_v47 = vsel %vm1215_vm11, %v1198_v20, %v995_v36 }
 0x11c   : > { %1927 = vmatmul.mubr.msk.bf16.gmra.mrb[8].mxu0 %vm1264_vm12, %v1227_v47  ;;  %v794_v13 = vpop.permute.xlu0 %793 }
 0x11d   : > { %v1028_v14 = vsel %vm1012_vm4, %v3456_v55, %v794_v13 }
 0x11e   : > { %v822_v33 = vpop.permute.xlu1 %821 }
 0x11f   : > { %v1055_v35 = vsel %vm1041_vm5, %v1026_v34, %v822_v33 }
 0x120   : > { %v832_v10 = vpop.permute.xlu0 %831 }
 0x121   : > { %v1065_v21 = vsel %vm1041_vm5, %v1036_v44, %v832_v10 }
 0x122   : > { %v860_v11 = vpop.permute.xlu1 %859 }
 0x123   : > { %v1092_v46 = vsel %vm1070_vm6, %v1063_v19, %v860_v11 }
 0x124   : > { %v824_v5 = vpop.permute.xlu0 %823 }
 0x125   : > { %v1057_v27 = vsel %vm1041_vm5, %v1028_v14, %v824_v5 }
 0x126   : > { %v852_v9 = vpop.permute.xlu1 %851 }
 0x127   : > { %v1084_v54 = vsel %vm1070_vm6, %v1055_v35, %v852_v9 }
 0x128   : > { %v862_v53 = vpop.permute.xlu0 %861 }
 0x129   : > { %v1094_v2 = vsel %vm1070_vm6, %v1065_v21, %v862_v53 }
 0x12a   : > { %v889_v37 = vpop.permute.xlu1 %888 }
 0x12b   : > { %v1121_v23 = vsel %vm1099_vm7, %v1092_v46, %v889_v37 }
 0x12c   : > { %v854_v25 = vpop.permute.xlu0 %853 }
 0x12d   : > { %v1086_v29 = vsel %vm1070_vm6, %v1057_v27, %v854_v25  ;;  %v1491_v27 = vlaneseq }
 0x12e   : > { %v881_v8 = vpop.permute.xlu1 %880 }
 0x12f   : > { %v1113_v0 = vsel %vm1099_vm7, %v1084_v54, %v881_v8 }
 0x130   : > { %v891_v18 = vpop.permute.xlu0 %890 }
 0x131   : > { %v1123_v22 = vsel %vm1099_vm7, %v1094_v2, %v891_v18 }
 0x132   : > { %v918_v3 = vpop.permute.xlu1 %917 }
 0x133   : > { %v1150_v15 = vsel %vm1128_vm8, %v1121_v23, %v918_v3 }
 0x134   : > { %v883_v32 = vpop.permute.xlu0 %882 }
 0x135   : > { %v1115_v4 = vsel %vm1099_vm7, %v1086_v29, %v883_v32  ;;  %v1492_v29 = vshrl.u32 %v1491_v27, 7 }
 0x136   : > { %v910_v63 = vpop.permute.xlu1 %909 }
 0x137   : > { %v1142_v62 = vsel %vm1128_vm8, %v1113_v0, %v910_v63 }
 0x138   : > { %v920_v31 = vpop.permute.xlu0 %919 }
 0x139   : > { %v1152_v39 = vsel %vm1128_vm8, %v1123_v22, %v920_v31 }
 0x13a   : > { %v947_v16 = vpop.permute.xlu1 %946 }
 0x13b   : > { %v1179_v26 = vsel %vm1157_vm9, %v1150_v15, %v947_v16 }
 0x13c   : > { %v912_v28 = vpop.permute.xlu0 %911 }
 0x13d   : > { %v1144_v20 = vsel %vm1128_vm8, %v1115_v4, %v912_v28 }
 0x13e   : > { %v939_v61 = vpop.permute.xlu1 %938 }
 0x13f   : > { %v1171_v59 = vsel %vm1157_vm9, %v1142_v62, %v939_v61 }
 0x140   : > { %v949_v51 = vpop.permute.xlu0 %948 }
 0x141   : > { %v1181_v57 = vsel %vm1157_vm9, %v1152_v39, %v949_v51 }
 0x142   : > { %v976_v12 = vpop.permute.xlu1 %975 }
 0x143   : > { %v1208_v50 = vsel %vm1186_vm10, %v1179_v26, %v976_v12 }
 0x144   : > { %v941_v6 = vpop.permute.xlu0 %940 }
 0x145   : > { %v1173_v47 = vsel %vm1157_vm9, %v1144_v20, %v941_v6  ;;  %v3206_v20 = vld [vmem:[%s3339_s2] ss:$0 sm:$0xff] }
 0x146   : > { %v968_v38 = vpop.permute.xlu1 %967 }
 0x147   : > { %v1200_v24 = vsel %vm1186_vm10, %v1171_v59, %v968_v38 }
 0x148   : > { %v978_v56 = vpop.permute.xlu0 %977 }
 0x149   : > { %v1210_v49 = vsel %vm1186_vm10, %v1181_v57, %v978_v56 }
 0x14a   : > { %v1005_v41 = vpop.permute.xlu1 %1004 }
 0x14b   : > { %v1237_v30 = vsel %vm1215_vm11, %v1208_v50, %v1005_v41 }
 0x14c   : > { %1938 = vmatprep.mubr.msk.bf16.mxu1 %vm1264_vm12, %v1237_v30  ;;  %v804_v45 = vpop.permute.xlu0 %803 }
 0x14d   : > { %v1038_v3 = vsel %vm1012_vm4, %v2820_v52, %v804_v45 }
 0x14e   : > { %v970_v40 = vpop.permute.xlu1 %969 }
 0x14f   : > { %v1202_v13 = vsel %vm1186_vm10, %v1173_v47, %v970_v40 }
 0x150   : > { %v997_v43 = vpop.permute.xlu0 %996 }
 0x151   : > { %v1229_v48 = vsel %vm1215_vm11, %v1200_v24, %v997_v43 }
 0x152   : > { %v1007_v7 = vpop.permute.xlu1 %1006  ;;  %1930 = vmatprep.mubr.msk.bf16.mxu0 %vm1264_vm12, %v1229_v48 }
 0x153   : > { %v1239_v60 = vsel %vm1215_vm11, %v1210_v49, %v1007_v7 }
 0x154   : > { %1939 = vmatmul.mubr.msk.bf16.gmra.mrb[4].mxu1 %vm1264_vm12, %v1239_v60  ;;  %v806_v58 = vpop.permute.xlu0 %805 }
 0x155   : > { %v1040_v31 = vsel %vm1012_vm4, %v2885_v42, %v806_v58  ;;  %vm1616_vm4 = vcmask 57344  }
 0x156   : > { %v834_v36 = vpop.permute.xlu1 %833 }
 0x157   : > { %v1067_v63 = vsel %vm1041_vm5, %v1038_v3, %v834_v36 }
 0x158   : > { %v999_v33 = vpop.permute.xlu0 %998 }
 0x159   : > { %v1231_v10 = vsel %vm1215_vm11, %v1202_v13, %v999_v33  ;;  %v1494_v13 = vadd.s32 16, %v1492_v29 }
 0x15a   : > { %v836_v11 = vpop.permute.xlu1 %835  ;;  %1931 = vmatmul.mubr.msk.bf16.gmra.mrb[12].mxu0 %vm1264_vm12, %v1231_v10 }
 0x15b   : > { %v1069_v61 = vsel %vm1041_vm5, %v1040_v31, %v836_v11  ;;  %v1493_v11 = vadd.s32 8, %v1492_v29 }
 0x15c   : > { %v864_v5 = vpop.permute.xlu0 %863 }
 0x15d   : > { %v1096_v16 = vsel %vm1070_vm6, %v1067_v63, %v864_v5  ;;  %v1510_v31 = vand.u32 7, %v1493_v11 }
 0x15e   : > { %v866_v9 = vpop.permute.xlu1 %865 }
 0x15f   : > { %v1098_v12 = vsel %vm1070_vm6, %v1069_v61, %v866_v9  ;;  %vm1584_vm15 = vcmp.lt.s32.totalorder %v1510_v31, 7 }
 0x160   : > { %v893_v53 = vpop.permute.xlu0 %892 }
 0x161   : > { %v1125_v51 = vsel %vm1099_vm7, %v1096_v16, %v893_v53 }
 0x162   : > { %v895_v37 = vpop.permute.xlu1 %894 }
 0x163   : > { %v1127_v52 = vsel %vm1099_vm7, %v1098_v12, %v895_v37  ;;  %v1517_v37 = vand.u32 7, %v1494_v13 }
 0x164   : > { %v922_v25 = vpop.permute.xlu0 %921 }
 0x165   : > { %v1154_v1 = vsel %vm1128_vm8, %v1125_v51, %v922_v25  ;;  %v1503_v25 = vand.u32 7, %v1492_v29  ;;  %vm1585_vm13 = vcmp.lt.s32.totalorder %v1517_v37, 7 }
 0x166   : > { %v924_v8 = vpop.permute.xlu1 %923 }
 0x167   : > { %v1156_v19 = vsel %vm1128_vm8, %v1127_v52, %v924_v8  ;;  %vm1583_vm14 = vcmp.lt.s32.totalorder %v1503_v25, 7 }
 0x168   : > { %v951_v18 = vpop.permute.xlu0 %950 }
 0x169   : > { %v1183_v6 = vsel %vm1157_vm9, %v1154_v1, %v951_v18 }
 0x16a   : > { %v953_v32 = vpop.permute.xlu1 %952 }
 0x16b   : > { %v1185_v38 = vsel %vm1157_vm9, %v1156_v19, %v953_v32 }
 0x16c   : > { %v980_v28 = vpop.permute.xlu0 %979 }
 0x16d   : > { %v1212_v42 = vsel %vm1186_vm10, %v1183_v6, %v980_v28 }
 0x16e   : > { %v982_v17 = vpop.permute.xlu1 %981 }
 0x16f   : > { %v1214_v15 = vsel %vm1186_vm10, %v1185_v38, %v982_v17 }
 0x170   : > { %v1009_v46 = vpop.permute.xlu0 %1008 }
 0x171   : > { %v1241_v23 = vsel %vm1215_vm11, %v1212_v42, %v1009_v46 }
 0x172   : > { %v1011_v56 = vpop.permute.xlu1 %1010  ;;  %1942 = vmatprep.mubr.msk.bf16.mxu1 %vm1264_vm12, %v1241_v23 }
 0x173   : > { %v1243_v26 = vsel %vm1215_vm11, %v1214_v15, %v1011_v56 }
 0x174   : > { %1943 = vmatmul.mubr.msk.bf16.gmra.mrb[8].mxu1 %vm1264_vm12, %v1243_v26 }
 0x189   : > { %v1920_v34 = vpop.f32.mrb[0].mxu0 }
 0x18a   : > { %v1331_v50 = vpop.f32.mrb[1].mxu0 }
 0x18b   : > { %v1921_v41 = vpop.f32.mrb[2].mxu0 }
 0x18c   : > { %v1334_v35 = vpop.f32.mrb[3].mxu0 }
 0x1af   : > { %v1924_v30 = vpop.f32.mrb[4].mxu0 }
 0x1b0   : > { %v1347_v44 = vpop.f32.mrb[5].mxu0 }
 0x1b1   : > { %v1925_v54 = vpop.f32.mrb[6].mxu0 }
 0x1b2   : > { %v1442_v45 = vmax.f32 %v1331_v50, %v1925_v54  ;;  %v1350_v21 = vpop.f32.mrb[7].mxu0 }
 0x1e7   : > { %v1936_v0 = vpop.f32.mrb[0].mxu1 }
 0x1e8   : > { %v1395_v2 = vpop.f32.mrb[1].mxu1 }
 0x1e9   : > { %v1937_v62 = vpop.f32.mrb[2].mxu1 }
 0x1ea   : > { %v1398_v40 = vpop.f32.mrb[3].mxu1 }
 0x1ef   : > { %v1928_v22 = vpop.f32.mrb[8].mxu0 }
 0x1f0   : > { %v1445_v59 = vmax.f32 %v1921_v41, %v1928_v22  ;;  %v1363_v39 = vpop.f32.mrb[9].mxu0 }
 0x1f1   : > { %v1443_v24 = vmax.f32 %v1334_v35, %v1363_v39  ;;  %v1929_v43 = vpop.f32.mrb[10].mxu0 }
 0x1f2   : > { %v1446_v57 = vmax.f32 %v1347_v44, %v1929_v43  ;;  %v1366_v48 = vpop.f32.mrb[11].mxu0  ;;  %v3198_v55 = vmax.f32 %v1445_v59, %v1398_v40 }
 0x1f3   : > { %v1444_v14 = vmax.f32 %v1920_v34, %v1366_v48 }
 0x1f4   : > { %v3200_v49 = vmax.f32 %v1446_v57, %v1936_v0 }
 0x1f5   : > { %v1451_v7 = vmax.f32 %v1444_v14, %v1395_v2  ;;  %v1498_v2 = vadd.s32 48, %v1492_v29 }
 0x1f7   : > { %v1545_v27 = vand.u32 7, %v1498_v2 }
 0x1f9   : > { %vm1589_vm2 = vcmp.lt.s32.totalorder %v1545_v27, 7 }
 0x227   : > { %v1940_v60 = vpop.f32.mrb[4].mxu1 }
 0x228   : > { %v1411_v58 = vpop.f32.mrb[5].mxu1 }
 0x229   : > { %v1941_v4 = vpop.f32.mrb[6].mxu1 }
 0x22a   : > { %v1458_v36 = vmax.f32 %v1451_v7, %v1941_v4  ;;  %v1414_v47 = vpop.f32.mrb[7].mxu1 }
 0x22c   : > { %v1472_v33 = vadd.f32 %v3206_v20, %v1458_v36 }
 0x22d   : > { %v1932_v10 = vpop.f32.mrb[12].mxu0 }
 0x22e   : > { %v1479_v5 = vmax.f32 %v1472_v33, 0.0  ;;  %v1449_v9 = vmax.f32 %v1442_v45, %v1932_v10  ;;  %v1379_v53 = vpop.f32.mrb[13].mxu0  ;;  %v1495_v45 = vadd.s32 24, %v1492_v29 }
 0x22f   : > { %v1447_v8 = vmax.f32 %v1350_v21, %v1379_v53  ;;  %v1933_v18 = vpop.f32.mrb[14].mxu0  ;;  %v1497_v21 = vadd.s32 40, %v1492_v29 }
 0x230   : > { %1486 = vst.msk [vmem:[%s3212_s14 + $0x10] sm:$0xff] %vm1041_vm5, %v1479_v5  ;;  %v1456_v3 = vmax.f32 %v1449_v9, %v1414_v47  ;;  %v1450_v32 = vmax.f32 %v1443_v24, %v1933_v18  ;;  %v1382_v63 = vpop.f32.mrb[15].mxu0  ;;  %v1592_v52 = vsel %vm1585_vm13, %v1479_v5, 0.0  ;;  %v1524_v59 = vand.u32 7, %v1495_v45 }
 0x231   : > { %v1448_v16 = vmax.f32 %v1924_v30, %v1382_v63  ;;  %v1454_v28 = vmax.f32 %v1447_v8, %v1937_v62  ;;  %v1620_v38 = vmul.f32 %v1592_v52, %v1592_v52  ;;  %v1600_v34 = vsel %vm1041_vm5, %v1592_v52, 0.0 }
 0x232   : > { %v1470_v61 = vadd.f32 %v3206_v20, %v1456_v3  ;;  %v1457_v51 = vmax.f32 %v1450_v32, %v1940_v60  ;;  %v1496_v62 = vadd.s32 32, %v1492_v29  ;;  %v1538_v39 = vand.u32 7, %v1497_v21 }
 0x233   : > { %v1455_v12 = vmax.f32 %v1448_v16, %v1411_v58  ;;  %v1628_v44 = vsel %vm1041_vm5, %v1620_v38, 0.0  ;;  %vm1586_vm0 = vcmp.lt.s32.totalorder %v1524_v59, 7 }
 0x234   : > { %v1477_v1 = vmax.f32 %v1470_v61, 0.0  ;;  %v1471_v17 = vadd.f32 %v3206_v20, %v1457_v51  ;;  %v1531_v58 = vand.u32 7, %v1496_v62  ;;  %vm1588_vm1 = vcmp.lt.s32.totalorder %v1538_v39, 7 }
 0x236   : > { %1484 = vst.msk [vmem:[%s3212_s14] sm:$0xff] %vm1041_vm5, %v1477_v1  ;;  %v1590_v6 = vsel %vm1583_vm14, %v1477_v1, 0.0  ;;  %v1478_v19 = vmax.f32 %v1471_v17, 0.0  ;;  %vm1587_vm3 = vcmp.lt.s32.totalorder %v1531_v58, 7 }
 0x237   : > { %v1618_v42 = vmul.f32 %v1590_v6, %v1590_v6  ;;  %v1597_v23 = vsel %vm1041_vm5, %v1590_v6, 0.0 }
 0x238   : > { %1485 = vst.msk [vmem:[%s3212_s14 + $0x8] sm:$0xff] %vm1041_vm5, %v1478_v19  ;;  %v1591_v46 = vsel %vm1584_vm15, %v1478_v19, 0.0 }
 0x239   : > { %v1598_v15 = vsel %vm1041_vm5, %v1591_v46, 0.0  ;;  %v1619_v56 = vmul.f32 %v1591_v46, %v1591_v46  ;;  %v1625_v50 = vsel %vm1041_vm5, %v1618_v42, 0.0 }
 0x23a   : > { %v1599_v26 = vadd.f32 %v1598_v15, %v1597_v23 }
 0x23b   : > { %v1626_v41 = vsel %vm1041_vm5, %v1619_v56, 0.0 }
 0x23c   : > { %v1627_v35 = vadd.f32 %v1626_v41, %v1625_v50  ;;  %v1601_v30 = vadd.f32 %v1600_v34, %v1599_v26 }
 0x23e   : > { %v1629_v54 = vadd.f32 %v1628_v44, %v1627_v35 }
 0x247   : > { %v1944_v0 = vpop.f32.mrb[8].mxu1 }
 0x248   : > { %v1461_v40 = vmax.f32 %v1454_v28, %v1944_v0  ;;  %v1427_v22 = vpop.f32.mrb[9].mxu1 }
 0x249   : > { %v1459_v24 = vmax.f32 %v3198_v55, %v1427_v22  ;;  %v1945_v43 = vpop.f32.mrb[10].mxu1 }
 0x24a   : > { %v1475_v57 = vadd.f32 %v3206_v20, %v1461_v40  ;;  %v1462_v48 = vmax.f32 %v1455_v12, %v1945_v43  ;;  %v1430_v14 = vpop.f32.mrb[11].mxu1 }
 0x24b   : > { %v1473_v7 = vadd.f32 %v3206_v20, %v1459_v24  ;;  %v1460_v60 = vmax.f32 %v3200_v49, %v1430_v14 }
 0x24c   : > { %v1482_v29 = vmax.f32 %v1475_v57, 0.0  ;;  %v1476_v4 = vadd.f32 %v3206_v20, %v1462_v48 }
 0x24d   : > { %v1480_v55 = vmax.f32 %v1473_v7, 0.0  ;;  %v1474_v36 = vadd.f32 %v3206_v20, %v1460_v60 }
 0x24e   : > { %1489 = vst.msk [vmem:[%s3212_s14 + $0x28] sm:$0xff] %vm1041_vm5, %v1482_v29  ;;  %v1483_v47 = vmax.f32 %v1476_v4, 0.0  ;;  %v1595_v49 = vsel %vm1588_vm1, %v1482_v29, 0.0 }
 0x24f   : > { %1487 = vst.msk [vmem:[%s3212_s14 + $0x18] sm:$0xff] %vm1041_vm5, %v1480_v55  ;;  %v1593_v13 = vsel %vm1586_vm0, %v1480_v55, 0.0  ;;  %v1481_v33 = vmax.f32 %v1474_v36, 0.0  ;;  %v1623_v37 = vmul.f32 %v1595_v49, %v1595_v49  ;;  %v1606_v32 = vsel %vm1041_vm5, %v1595_v49, 0.0 }
 0x250   : > { %v1602_v10 = vsel %vm1041_vm5, %v1593_v13, 0.0  ;;  %v1621_v11 = vmul.f32 %v1593_v13, %v1593_v13  ;;  %1490 = vst.msk [vmem:[%s3212_s14 + $0x30] sm:$0xff] %vm1041_vm5, %v1483_v47  ;;  %v1596_v9 = vsel %vm1589_vm2, %v1483_v47, 0.0 }
 0x251   : > { %v1603_v5 = vadd.f32 %v1602_v10, %v1601_v30  ;;  %1488 = vst.msk [vmem:[%s3212_s14 + $0x20] sm:$0xff] %vm1041_vm5, %v1481_v33  ;;  %v1594_v53 = vsel %vm1587_vm3, %v1481_v33, 0.0  ;;  %v1624_v63 = vmul.f32 %v1596_v9, %v1596_v9  ;;  %v1634_v61 = vsel %vm1041_vm5, %v1623_v37, 0.0  ;;  %s2063_s14 = scalar_lea.vmem %s2062_s13, 32 }
 0x252   : > { %v1630_v20 = vsel %vm1041_vm5, %v1621_v11, 0.0  ;;  %v1604_v8 = vsel %vm1041_vm5, %v1594_v53, 0.0  ;;  %v1622_v18 = vmul.f32 %v1594_v53, %v1594_v53  ;;  %v1608_v51 = vsel %vm1041_vm5, %v1596_v9, 0.0  ;;  %p2065_p1 = scmp.lt.s32.totalorder %s2063_s14, %s2057_s11 }
 0x253   : > { %v1631_v25 = vadd.f32 %v1630_v20, %v1629_v54  ;;  %v1605_v3 = vadd.f32 %v1604_v8, %v1603_v5  ;;  %v1636_v17 = vsel %vm1041_vm5, %v1624_v63, 0.0 }
 0x254   : > { %v1632_v31 = vsel %vm1041_vm5, %v1622_v18, 0.0  ;;  %p2066_p2 = por %p2065_p1, %p2064_p0 }
 0x255   : > { %v1607_v16 = vadd.f32 %v1606_v32, %v1605_v3  ;;  %v1633_v28 = vadd.f32 %v1632_v31, %v1631_v25 }
 0x256   : > { %p2067_p3 = pnand %p2066_p2, %p2060_p13 }
 0x257   : > { %v1609_v12 = vadd.f32 %v1608_v51, %v1607_v16  ;;  %v1635_v1 = vadd.f32 %v1634_v61, %v1633_v28 }
 0x259   : > { %v1610_v52 = vrot.slane %v1609_v12, 4  ;;  %v1637_v6 = vadd.f32 %v1636_v17, %v1635_v1 }
 0x25b   : > { %v1611_v19 = vadd.f32 %v1610_v52, %v1609_v12  ;;  %v1638_v42 = vrot.slane %v1637_v6, 4 }
 0x25d   : > { %v1612_v46 = vrot.slane %v1611_v19, 2  ;;  %v1639_v38 = vadd.f32 %v1638_v42, %v1637_v6 }
 0x25f   : > { %v1613_v23 = vadd.f32 %v1612_v46, %v1611_v19  ;;  %v1640_v15 = vrot.slane %v1639_v38, 2 }
 0x261   : > { %v1614_v56 = vrot.slane %v1613_v23, 1  ;;  %v1641_v26 = vadd.f32 %v1640_v15, %v1639_v38 }
 0x263   : > { %v1615_v34 = vadd.f32 %v1614_v56, %v1613_v23  ;;  %v1642_v50 = vrot.slane %v1641_v26, 1 }
 0x265   : > { %1617 = vst.msk [vmem:[%s227_s16] sm:$0x1] %vm1616_vm4, %v1615_v34  ;;  %v1643_v41 = vadd.f32 %v1642_v50, %v1641_v26 }
 0x266   : > { %2070 = shalt.err (!%p2067_p3)
}
 0x267   : > { %s2071_s15 = scalar_lea.hbm %s3261_s7, 16  ;;  %s2075_s6 = scalar_lea.hbm %s3341_s4, 32 }
 0x268   : > { %p2072_p4 = scmp.ne.s32.totalorder %s3261_s7, %s2071_s15  ;;  %p2076_p9 = scmp.lt.u32.totalorder %s3261_s7, %s3341_s4 }
 0x269   : > { %p2077_p10 = scmp.lt.u32.totalorder %s2075_s6, %s2071_s15  ;;  %p2079_p12 = scmp.lt.u32.totalorder %s2071_s15, %s3261_s7 }
 0x26a   : > { %p2073_p7 = pnand %p2072_p4, %p2231_p5 }
 0x26b   : > { %p2078_p11 = por %p2077_p10, %p2076_p9 }
 0x26c   : > { %p2074_p8 = pneg %p2073_p7 }
 0x26d   : > { %p2080_p13 = por %p2079_p12, %p2078_p11 }
 0x26f   : > { %p2081_p0 = pnand %p2080_p13, %p2074_p8 }
 0x271   : > { %2084 = shalt.err (!%p2081_p0)
}
 0x272   : > { %1956 = dma.vmem_to_hbm [thread:$0]  (%p2231_p5), %s3263_s17, 16, %s3261_s7, %s1651_s10   ;;  %1644 = vst.msk [vmem:[%s233_s23] sm:$0x1] %vm1616_vm4, %v1643_v41 }
 0x273   : > { %s1655_s11 = scalar_lea.sflag [#allocation5], %s3251_s30  ;;  %s2085_s12 = scalar_lea.vmem %s3271_s25, 16 }
 0x274   : > { %p2086_p1 = scmp.ne.s32.totalorder %s3271_s25, %s2085_s12  ;;  %s2162_s13 = smov [#allocation4]  }
 0x275   : > { %s2089_s14 = sshll.u32 %s2162_s13, 4  ;;  %s2090_s14 = int_to_ptr.vmem [resolvable:$false] %s2089_s14 }
 0x276   : > { %p2087_p2 = pnand %p2086_p1, %p2231_p5  ;;  %s2091_s15 = scalar_lea.vmem %s2090_s14, 32 }
 0x277   : > { %p2092_p4 = scmp.lt.s32.totalorder %s3271_s25, %s2090_s14  ;;  %p2093_p7 = scmp.lt.s32.totalorder %s2091_s15, %s2085_s12 }
 0x278   : > { %p2088_p3 = pneg %p2087_p2 }
 0x279   : > { %p2094_p8 = por %p2093_p7, %p2092_p4 }
 0x27b   : > { %p2095_p9 = pnand %p2094_p8, %p2088_p3 }
 0x27d   : > { %2098 = shalt.err (!%p2095_p9)
}
 0x27e   : > { %s2099_s30 = scalar_lea.hbm %s3269_s9, 16  ;;  %s2103_s7 = scalar_lea.hbm %s3342_s5, 32 }
 0x27f   : > { %p2100_p10 = scmp.ne.s32.totalorder %s3269_s9, %s2099_s30  ;;  %p2104_p13 = scmp.lt.u32.totalorder %s3269_s9, %s3342_s5 }
 0x280   : > { %p2105_p0 = scmp.lt.u32.totalorder %s2103_s7, %s2099_s30  ;;  %p2107_p2 = scmp.lt.u32.totalorder %s2099_s30, %s3269_s9 }
 0x281   : > { %p2101_p11 = pnand %p2100_p10, %p2231_p5 }
 0x282   : > { %p2106_p1 = por %p2105_p0, %p2104_p13 }
 0x283   : > { %p2102_p12 = pneg %p2101_p11 }
 0x284   : > { %p2108_p3 = por %p2107_p2, %p2106_p1 }
 0x286   : > { %p2109_p4 = pnand %p2108_p3, %p2102_p12 }
 0x288   : > { %2112 = shalt.err (!%p2109_p4)
}
 0x289   : > { %1957 = dma.vmem_to_hbm [thread:$0]  (%p2231_p5), %s3271_s25, 16, %s3269_s9, %s1655_s11  }
 0x28a PF: > { %p1967_p7 = scmp.ge.s32.totalorder %s2151_s21, 2  ;;  %s1703_s26 = sand.u32 1, %s2139_s18  }
 0x28b   : > { %s1704_s6 = scalar_lea.sflag [#allocation3], %s1703_s26 }
 0x28c   : > { %p1961_p8 = pnand %p1967_p7, %p2235_p6 }
 0x28e   : > { %2130 = dma.done.wait (!%p1961_p8), %s1704_s6, 16  }
 0x28f   : > { %2132 = vsyncadd (!%p1961_p8), %s1704_s6, 4294967280  ;;  %s1712_s22 = scalar_lea.sflag [#allocation5], %s1703_s26 }
 0x290   : > { %2134 = dma.done.wait (!%p1961_p8), %s1712_s22, 16  }
 0x291   : > { %2136 = vsyncadd (!%p1961_p8), %s1712_s22, 4294967280  ;;  %p19_p5 = scmp.ge.s32.totalorder %s2218_s24, 4   ;;  %s3457_s18 = smov %s2143_s19 }
 0x292   : > { %s3458_s19 = smov %s2147_s20  ;;  %s3459_s20 = smov %s2229_s27 }
 0x293   : > { %s3460_s21 = smov %s2218_s24  ;;  %21 = sbr.rel (!%p19_p5) target bundleno = 5 (0x5), region = 99 }
 0x29a   :  { %1716 = vsyncpa [#allocation3], 1 }
 0x29b   :  { %1718 = vsyncpa [#allocation3 + $0x1], 1 }
 0x29c   :  { %1719 = vsyncpa [#allocation5], 1 }
 0x29d   :  { %1721 = vsyncpa [#allocation5 + $0x1], 1 }

</bundles_post_ra>
